<compile_context>
chip_gen: v5e
topology: v5e:2x2
jax: 0.10.0
libtpu: 0.0.40
codegen_flags: <defaults>
</compile_context>

<pallas_src>
import functools

import jax
import jax.numpy as jnp
from jax.experimental import pallas as pl
from jax.experimental.pallas import tpu as pltpu


def _conv_tanh_kernel(x_ref, w_ref, b_ref, o_ref, *,
                      Nb, C, KH, KW, SH, SW, OH, OW):
    # x_ref: (Nb, C, Hp, Wp) padded input tile (native dtype)
    # w_ref: (OC, KH*KW*C)   flattened weights, tap-major (native dtype)
    # b_ref: (OC, 1)         bias in f32 (zeros if bias=False)
    # o_ref: (Nb, OC, OH*OW) lane-dense output tile
    P = OH * OW
    w = w_ref[...]                      # native dtype -> MXU
    b = b_ref[...]                      # f32

    # im2col: gather all taps of all images into one (KH*KW*C, Nb*P) slab.
    cols = []
    for n in range(Nb):
        xn = x_ref[n]                                               # (C, Hp, Wp)
        for kh in range(KH):
            for kw in range(KW):
                xs = xn[:, kh:kh + SH * OH:SH, kw:kw + SW * OW:SW]  # (C, OH, OW)
                cols.append(xs.reshape(C, P))
    slabs = [jnp.concatenate(cols[n * KH * KW:(n + 1) * KH * KW], axis=0)
             for n in range(Nb)]                                    # Nb x (KH*KW*C, P)
    slab = slabs[0] if Nb == 1 else jnp.concatenate(slabs, axis=1)  # (KH*KW*C, Nb*P)

    # One MXU matmul with f32 accumulation.
    acc = jnp.dot(w, slab, preferred_element_type=jnp.float32)      # (OC, Nb*P)

    # f32 epilogue (bias + tanh), lane-dense stores per image.
    for n in range(Nb):
        yn = acc[:, n * P:(n + 1) * P] + b
        o_ref[n] = jnp.tanh(yn).astype(o_ref.dtype)


def conv2d_tanh(x, w, b=None, *, stride=(1, 1), padding=(0, 0), block_n=None):
    """x: (N, C, H, W); w: (OC, C, KH, KW); b: (OC,) or None."""
    N, C, H, W = x.shape
    OC, _, KH, KW = w.shape
    SH, SW = stride
    PH, PW = padding
    OH = (H + 2 * PH - KH) // SH + 1
    OW = (W + 2 * PW - KW) // SW + 1
    P = OH * OW

    # Spatial zero-padding is glue; do it in plain JAX.
    x_pad = jnp.pad(x, ((0, 0), (0, 0), (PH, PH), (PW, PW)))
    Hp, Wp = H + 2 * PH, W + 2 * PW

    # Batch block size: widen the GEMM lane dim (Nb*OH*OW) when OH*OW is
    # small, but keep >= 2 grid steps when possible so both v7x TensorCores
    # get work on the "parallel" batch axis.
    if block_n is None:
        block_n = max(1, 512 // max(P, 1))
        block_n = min(block_n, N)
        if N > 1:
            block_n = min(block_n, pl.cdiv(N, 2))
    n_blocks = pl.cdiv(N, block_n)
    Np = n_blocks * block_n
    if Np != N:
        x_pad = jnp.pad(x_pad, ((0, Np - N), (0, 0), (0, 0), (0, 0)))

    # Flatten weights tap-major (matches the in-kernel slab row order); free.
    w_flat = jnp.transpose(w, (0, 2, 3, 1)).reshape(OC, KH * KW * C)

    if b is None:
        b = jnp.zeros((OC,), jnp.float32)
    b2 = b.reshape(OC, 1).astype(jnp.float32)

    kernel = functools.partial(
        _conv_tanh_kernel,
        Nb=block_n, C=C, KH=KH, KW=KW, SH=SH, SW=SW, OH=OH, OW=OW)

    out = pl.pallas_call(
        kernel,
        out_shape=jax.ShapeDtypeStruct((Np, OC, P), x.dtype),
        grid_spec=pltpu.PrefetchScalarGridSpec(
            num_scalar_prefetch=0,
            grid=(n_blocks,),
            in_specs=[
                pl.BlockSpec((block_n, C, Hp, Wp), lambda i: (i, 0, 0, 0)),
                pl.BlockSpec((OC, KH * KW * C), lambda i: (0, 0)),
                pl.BlockSpec((OC, 1), lambda i: (0, 0)),
            ],
            out_specs=pl.BlockSpec((block_n, OC, P), lambda i: (i, 0, 0)),
        ),
        compiler_params=pltpu.CompilerParams(
            dimension_semantics=("parallel",),
            # Tiny at LeNet sizes; re-derive tile sizes and this limit when
            # scaling (esp. v7x's 64 MiB physical VMEM), leaving headroom for
            # double-buffering.
            vmem_limit_bytes=32 * 1024 * 1024,
        ),
    )(x_pad, w_flat, b2)

    # Free layout plumbing back to NCHW.
    return out.reshape(Np, OC, OH, OW)[:N]


if __name__ == "__main__":
    # Module config (LeNet-style first conv, small shapes):
    in_channels, out_channels = 4, 8
    kernel_size = (3, 3)
    stride = (1, 1)
    padding = (1, 1)

    key = jax.random.PRNGKey(0)
    kx, kw, kb = jax.random.split(key, 3)

    N, H, W = 2, 16, 16
    x = jax.random.normal(kx, (N, in_channels, H, W), jnp.float32)

    # Deterministic parameter init (PyTorch-style uniform bound).
    fan_in = in_channels * kernel_size[0] * kernel_size[1]
    bound = 1.0 / (fan_in ** 0.5)
    w = jax.random.uniform(kw, (out_channels, in_channels) + kernel_size,
                           jnp.float32, -bound, bound)
    b = jax.random.uniform(kb, (out_channels,), jnp.float32, -bound, bound)

    # Reference: XLA conv with the same NCHW/OIHW semantics as PyTorch.
    ref = jax.lax.conv_general_dilated(
        x, w, window_strides=stride,
        padding=[(padding[0], padding[0]), (padding[1], padding[1])],
        dimension_numbers=("NCHW", "OIHW", "NCHW"))
    ref = jnp.tanh(ref + b.reshape(1, -1, 1, 1))

    # Default batch blocking (block_n=1 here -> 2 parallel grid steps).
    out = conv2d_tanh(x, w, b, stride=stride, padding=padding)
    out = jax.block_until_ready(out)
    assert out.shape == ref.shape == (N, out_channels, H, W)
    assert jnp.allclose(out, ref, atol=1e-5, rtol=1e-5)

    # Batch folded into the GEMM lane dim (block_n=2 -> one wider GEMM/step).
    out2 = conv2d_tanh(x, w, b, stride=stride, padding=padding, block_n=2)
    out2 = jax.block_until_ready(out2)
    assert jnp.allclose(out2, ref, atol=1e-5, rtol=1e-5)

    print("KERNEL_OK")
</pallas_src>

<mosaic_0001>
module attributes {stable_mosaic.version = 11 : i64} {
  func.func @_conv_tanh_kernel(%arg0: i32, %arg1: memref<1x4x18x18xf32, #tpu.memory_space<vmem>>, %arg2: memref<8x36xf32, #tpu.memory_space<vmem>>, %arg3: memref<8x1xf32, #tpu.memory_space<vmem>>, %arg4: memref<1x8x256xf32, #tpu.memory_space<vmem>>) attributes {dimension_semantics = [#tpu.dimension_semantics<parallel>], iteration_bounds = array<i64: 2>, scalar_prefetch = 0 : i64, scratch_operands = 0 : i64, tpu.core_type = #tpu.core_type<tc>, window_params = [{transform_indices = @transform_0, window_bounds = array<i64: 1, 4, 18, 18>}, {pipeline_mode = #tpu.pipeline_mode<synchronous>, transform_indices = @transform_1, window_bounds = array<i64: 8, 36>}, {pipeline_mode = #tpu.pipeline_mode<synchronous>, transform_indices = @transform_2, window_bounds = array<i64: 8, 1>}, {transform_indices = @transform_3, window_bounds = array<i64: 1, 8, 256>}]} {
    %c0 = arith.constant 0 : index
    %c0_0 = arith.constant 0 : index
    %0 = vector.load %arg2[%c0, %c0_0] : memref<8x36xf32, #tpu.memory_space<vmem>>, vector<8x36xf32>
    %c0_1 = arith.constant 0 : index
    %c0_2 = arith.constant 0 : index
    %1 = vector.load %arg3[%c0_1, %c0_2] : memref<8x1xf32, #tpu.memory_space<vmem>>, vector<8x1xf32>
    %c0_3 = arith.constant 0 : index
    %c0_4 = arith.constant 0 : index
    %c0_5 = arith.constant 0 : index
    %c0_6 = arith.constant 0 : index
    %2 = vector.load %arg1[%c0_3, %c0_4, %c0_5, %c0_6] : memref<1x4x18x18xf32, #tpu.memory_space<vmem>>, vector<1x4x18x18xf32>
    %3 = vector.shape_cast %2 : vector<1x4x18x18xf32> to vector<4x18x18xf32>
    %4 = vector.extract_strided_slice %3 {offsets = [0, 0, 0], sizes = [4, 16, 16], strides = [1, 1, 1]} : vector<4x18x18xf32> to vector<4x16x16xf32>
    %5 = vector.shape_cast %4 : vector<4x16x16xf32> to vector<4x256xf32>
    %6 = vector.extract_strided_slice %3 {offsets = [0, 0, 1], sizes = [4, 16, 16], strides = [1, 1, 1]} : vector<4x18x18xf32> to vector<4x16x16xf32>
    %7 = vector.shape_cast %6 : vector<4x16x16xf32> to vector<4x256xf32>
    %8 = vector.extract_strided_slice %3 {offsets = [0, 0, 2], sizes = [4, 16, 16], strides = [1, 1, 1]} : vector<4x18x18xf32> to vector<4x16x16xf32>
    %9 = vector.shape_cast %8 : vector<4x16x16xf32> to vector<4x256xf32>
    %10 = vector.extract_strided_slice %3 {offsets = [0, 1, 0], sizes = [4, 16, 16], strides = [1, 1, 1]} : vector<4x18x18xf32> to vector<4x16x16xf32>
    %11 = vector.shape_cast %10 : vector<4x16x16xf32> to vector<4x256xf32>
    %12 = vector.extract_strided_slice %3 {offsets = [0, 1, 1], sizes = [4, 16, 16], strides = [1, 1, 1]} : vector<4x18x18xf32> to vector<4x16x16xf32>
    %13 = vector.shape_cast %12 : vector<4x16x16xf32> to vector<4x256xf32>
    %14 = vector.extract_strided_slice %3 {offsets = [0, 1, 2], sizes = [4, 16, 16], strides = [1, 1, 1]} : vector<4x18x18xf32> to vector<4x16x16xf32>
    %15 = vector.shape_cast %14 : vector<4x16x16xf32> to vector<4x256xf32>
    %16 = vector.extract_strided_slice %3 {offsets = [0, 2, 0], sizes = [4, 16, 16], strides = [1, 1, 1]} : vector<4x18x18xf32> to vector<4x16x16xf32>
    %17 = vector.shape_cast %16 : vector<4x16x16xf32> to vector<4x256xf32>
    %18 = vector.extract_strided_slice %3 {offsets = [0, 2, 1], sizes = [4, 16, 16], strides = [1, 1, 1]} : vector<4x18x18xf32> to vector<4x16x16xf32>
    %19 = vector.shape_cast %18 : vector<4x16x16xf32> to vector<4x256xf32>
    %20 = vector.extract_strided_slice %3 {offsets = [0, 2, 2], sizes = [4, 16, 16], strides = [1, 1, 1]} : vector<4x18x18xf32> to vector<4x16x16xf32>
    %21 = vector.shape_cast %20 : vector<4x16x16xf32> to vector<4x256xf32>
    %22 = tpu.concatenate %5, %7, %9, %11, %13, %15, %17, %19, %21 in 0 : vector<4x256xf32>, vector<4x256xf32>, vector<4x256xf32>, vector<4x256xf32>, vector<4x256xf32>, vector<4x256xf32>, vector<4x256xf32>, vector<4x256xf32>, vector<4x256xf32> -> vector<36x256xf32>
    %cst = arith.constant dense<0.000000e+00> : vector<8x256xf32>
    %23 = tpu.matmul %0, %22, %cst {dimension_numbers = #tpu.dot_dimension_numbers<[1], [0], [0], [1], [0, 0, 1, 1], [], []>} : vector<8x36xf32>, vector<36x256xf32>, vector<8x256xf32> -> vector<8x256xf32>
    %24 = vector.broadcast %1 : vector<8x1xf32> to vector<8x256xf32>
    %25 = arith.addf %23, %24 : vector<8x256xf32>
    %26 = math.tanh %25 : vector<8x256xf32>
    %c0_7 = arith.constant 0 : index
    %c0_8 = arith.constant 0 : index
    %c0_9 = arith.constant 0 : index
    %27 = vector.load %arg4[%c0_7, %c0_8, %c0_9] : memref<1x8x256xf32, #tpu.memory_space<vmem>>, vector<1x8x256xf32>
    %28 = vector.shape_cast %27 : vector<1x8x256xf32> to vector<8x256xf32>
    %29 = vector.shape_cast %26 : vector<8x256xf32> to vector<1x8x256xf32>
    tpu.vector_store %arg4[%c0_7, %c0_8, %c0_9], %29 {strides = array<i32>} : memref<1x8x256xf32, #tpu.memory_space<vmem>>, vector<1x8x256xf32>,
    return
  }
  func.func @transform_0(%arg0: i32) -> (i32, i32, i32, i32) {
    %c0_i32 = arith.constant 0 : i32
    %c0_i32_0 = arith.constant 0 : i32
    %c0_i32_1 = arith.constant 0 : i32
    %c0_i32_2 = arith.constant 0 : i32
    return %arg0, %c0_i32, %c0_i32_0, %c0_i32_1 : i32, i32, i32, i32
  }
  func.func @transform_1(%arg0: i32) -> (i32, i32) {
    %c0_i32 = arith.constant 0 : i32
    %c0_i32_0 = arith.constant 0 : i32
    %c0_i32_1 = arith.constant 0 : i32
    return %c0_i32, %c0_i32_0 : i32, i32
  }
  func.func @transform_2(%arg0: i32) -> (i32, i32) {
    %c0_i32 = arith.constant 0 : i32
    %c0_i32_0 = arith.constant 0 : i32
    %c0_i32_1 = arith.constant 0 : i32
    return %c0_i32, %c0_i32_0 : i32, i32
  }
  func.func @transform_3(%arg0: i32) -> (i32, i32, i32) {
    %c0_i32 = arith.constant 0 : i32
    %c0_i32_0 = arith.constant 0 : i32
    %c0_i32_1 = arith.constant 0 : i32
    return %arg0, %c0_i32, %c0_i32_0 : i32, i32, i32
  }
}

</mosaic_0001>

<bundles_post_ra>
// kernel: tpu_custom_call.1
= control target key start
LH: loop header
LB: loop body
LE: loop exit
PB: predicated region body
PF: predicated region fallthrough
CT: control target
= control target key end

     0   :  { %8 = vsyncpa [#allocation3], 0  ;;  %s4276_s0 = inlined_call_operand.vmem [shape: f32[2,4,18,18], index: 0, kind: input, shape index: {}]   ;;  %s4277_s1 = inlined_call_operand.vmem [shape: f32[8,36], index: 1, kind: input, shape index: {}]   ;;  %s4278_s2 = inlined_call_operand.vmem [shape: f32[8,1], index: 2, kind: input, shape index: {}]   ;;  %s4279_s3 = inlined_call_operand.hbm [shape: f32[2,8,256], index: 3, kind: output, shape index: {}]  }
   0x1   :  { %10 = vsyncpa [#allocation3 + $0x1], 0  ;;  %s2764_s12 = smov 0   ;;  %s2766_s13 = smov 0  }
   0x2   :  { %s2768_s14 = smov 0   ;;  %s2770_s15 = smov 0  }
   0x3 LB: > { %s2785_s16 = sadd.s32 4294967295, %s2730_s15   ;;  %s2211_s17 = sadd.s32 4294967294, %s2730_s15   ;;  %s2730_s15 = sphi %s2770_s15, %s4311_s15   ;;  %s2726_s14 = sphi %s2768_s14, %s4310_s14   ;;  %s2722_s13 = sphi %s2766_s13, %s4309_s13   ;;  %s2718_s12 = sphi %s2764_s12, %s4308_s12  }
   0x4   : > { %s2789_s18 = sadd.s32 1, %s2730_s15   ;;  %s91_s19 = sadd.s32 1, %s2726_s14 }
   0x5   : > { %s88_s20 = ssub.s32 %s2730_s15, %s2789_s18  ;;  %p101_p0 = scmp.ne.s32.totalorder %s2726_s14, %s2722_s13 }
   0x6   : > { %p89_p1 = scmp.eq.s32.totalorder %s88_s20, 0  ;;  %p102_p2 = scmp.eq.s32.totalorder %s2785_s16, 1 }
   0x7   : > { %p107_p3 = scmp.ne.s32.totalorder %s2722_s13, %s2718_s12  ;;  %p108_p4 = scmp.eq.s32.totalorder %s2211_s17, 1 }
   0x8   : > { %s2800_s21 = scalar_select %p89_p1, %s2726_s14, %s91_s19  }
   0x9   : > { %p2802_p5 = por %p102_p2, %p101_p0  ;;  %p2806_p6 = por %p108_p4, %p107_p3 }
   0xa   : > { %p2214_p7 = scmp.ge.s32.totalorder %s2730_s15, 1  ;;  %p140_p8 = scmp.lt.s32.totalorder %s2730_s15, 3 }
   0xc   : > { %p141_p9 = pnand %p2214_p7, %p140_p8 }
   0xe   : > { %144 = sbr.rel (%p141_p9) target bundleno = 760 (0x2f8), region = 32 }
  0x13   : > { %p164_p10 = scmp.lt.s32.totalorder %s2785_s16, 1  ;;  %v2732_v0 = vmov 1983009808   ;;  %vm184_vm0 = vcmask 1047556   ;;  %v2733_v11 = vmov 1934713408  }
  0x14   : > { %v189_v1 = vunpack.c.l.s4 %v2732_v0  ;;  %v213_v12 = vunpack.c.l.s4 %v2733_v11  ;;  %s2734_s29 = smov 127   ;;  %s2735_s30 = smov 64   ;;  %vm797_vm1 = vcmask 1046528   ;;  %vm1420_vm2 = vcmask 1045504  }
  0x15   : > { %s165_s24 = scalar_select %p164_p10, %s2785_s16, 1  ;;  %vm352_vm3 = vcmask 130048   ;;  %vm354_vm4 = vcmask 261120   ;;  %vm356_vm5 = vcmask 392192   ;;  %vm358_vm6 = vcmask 523264  }
  0x16   : > { %v2842_v10 = vunpack.c.0.s8 %v189_v1  ;;  %v2873_v31 = vunpack.c.0.s8 %v213_v12  ;;  %s2736_s4 = smov 32   ;;  %s2737_s5 = smov 48   ;;  %vm360_vm7 = vcmask 654336   ;;  %vm362_vm8 = vcmask 785408  }
  0x17   : > { %s2227_s25 = smul.u32 96, %s165_s24  ;;  %s2738_s6 = smov 16   ;;  %vm364_vm9 = vcmask 916480   ;;  %vm2067_vm10 = vcmask 1043456   ;;  %vm2081_vm11 = vcmask 293888  }
  0x18   : > { %s2739_s7 = smov 96   ;;  %s2740_s8 = smov 112  }
  0x19   : > { %s2817_s28 = scalar_lea.vmem %s4276_s0, %s2227_s25  ;;  %s2741_s9 = smov 80  }
  0x1a   : > { %v2820_v2 = vld [vmem:[%s2817_s28] sm:$0xff]  ;;  %v2823_v3 = vld [vmem:[%s2817_s28 + $0x8] sm:$0xff]  ;;  %v2826_v4 = vld [vmem:[%s2817_s28 + $0x18] sm:$0xff]  ;;  %s2742_s10 = smov 126   ;;  %s161_s24 = sand.u32 1, %s2722_s13  }
  0x1b   : > { %v2830_v5 = vpack.i.bf16 %v2823_v3, %v2820_v2  ;;  %v2833_v6 = vld [vmem:[%s2817_s28 + $0x20] sm:$0xff]  ;;  %v2836_v7 = vld [vmem:[%s2817_s28 + $0x30] sm:$0xff]  ;;  %v2839_v8 = vld [vmem:[%s2817_s28 + $0x38] sm:$0xff]  ;;  %v186_v9 = vrot.slane %v2820_v2, 4  ;;  %v198_v15 = vrot.slane %v2826_v4, 4  ;;  %v242_v16 = vrot.slane %v2823_v3, 4 }
  0x1c   : > { %v2845_v13 = vld [vmem:[%s2817_s28 + $0x48] sm:$0xff]  ;;  %v2848_v14 = vld [vmem:[%s2817_s28 + $0x50] sm:$0xff]  ;;  %v254_v17 = vrot.slane %v2833_v6, 4  ;;  %v183_v18 = vrot.slane %v2836_v7, 4  ;;  %v240_v21 = vrot.slane %v2839_v8, 4  ;;  %s2215_s25 = sshll.u32 %s161_s24, 4 }
  0x1d   : > { %2280 = vrot.lane.b32.xlu1 %v2830_v5, %s2734_s29  ;;  %v187_v19 = vsel %vm184_vm0, %v2836_v7, %v186_v9  ;;  %v196_v20 = vrot.slane %v2845_v13, 4  ;;  %v252_v22 = vrot.slane %v2848_v14, 4  ;;  %v199_v24 = vsel %vm184_vm0, %v2845_v13, %v198_v15  ;;  %s2226_s26 = sshll.u32 %s2785_s16, 4 }
  0x1e   : > { %v195_v23 = vperm.slane %v187_v19, %v2842_v10  ;;  %v243_v25 = vsel %vm184_vm0, %v2839_v8, %v242_v16  ;;  %v255_v26 = vsel %vm184_vm0, %v2848_v14, %v254_v17  ;;  %v207_v27 = vperm.slane %v199_v24, %v2842_v10 }
  0x1f   : > { %v251_v28 = vperm.slane %v243_v25, %v2842_v10  ;;  %v263_v29 = vperm.slane %v255_v26, %v2842_v10  ;;  %v185_v30 = vsel %vm184_vm0, %v183_v18, %v2820_v2  ;;  %v197_v33 = vsel %vm184_vm0, %v196_v20, %v2826_v4  ;;  %v173_v20 = vld [vmem:[%s2817_s28 + $0x10] sm:$0x3] }
  0x20   : > { %v191_v32 = vperm.slane %v185_v30, %v2842_v10  ;;  %v241_v34 = vsel %vm184_vm0, %v240_v21, %v2823_v3  ;;  %v220_v35 = vrot.slane %v207_v27, 4  ;;  %v222_v36 = vrot.slane %v195_v23, 4 }
  0x21   : > { %v276_v37 = vrot.slane %v263_v29, 4  ;;  %v203_v38 = vperm.slane %v197_v33, %v2842_v10  ;;  %v278_v39 = vrot.slane %v251_v28, 4  ;;  %v247_v41 = vperm.slane %v241_v34, %v2842_v10  ;;  %v2935_v33 = vld [vmem:[%s2817_s28 + $0x40] sm:$0x3] }
  0x22   : > { %v210_v40 = vrot.slane %v191_v32, 4  ;;  %v253_v42 = vsel %vm184_vm0, %v252_v22, %v2833_v6  ;;  %v221_v43 = vsel %vm184_vm0, %v220_v35, %v195_v23  ;;  %v223_v54 = vsel %vm184_vm0, %v207_v27, %v222_v36 }
  0x23   : > { %v277_v44 = vsel %vm184_vm0, %v276_v37, %v251_v28  ;;  %v208_v45 = vrot.slane %v203_v38, 4  ;;  %v259_v46 = vperm.slane %v253_v42, %v2842_v10  ;;  %v227_v47 = vperm.slane %v221_v43, %v2873_v31  ;;  %v2930_v28 = vld [vmem:[%s2817_s28 + $0x28] sm:$0x3] }
  0x24   : > { %v2889_v48 = vperm.slane %v277_v44, %v2873_v31  ;;  %v211_v49 = vsel %vm184_vm0, %v203_v38, %v210_v40  ;;  %v266_v50 = vrot.slane %v247_v41, 4  ;;  %v231_v58 = vperm.slane %v223_v54, %v2873_v31 }
  0x25   : > { %v219_v51 = vperm.slane %v211_v49, %v2873_v31  ;;  %v264_v52 = vrot.slane %v259_v46, 4  ;;  %v209_v53 = vsel %vm184_vm0, %v208_v45, %v191_v32  ;;  %v279_v62 = vsel %vm184_vm0, %v263_v29, %v278_v39 }
  0x26   : > { %v2294_v55 = vpack.i.bf16 %v2889_v48, %v227_v47  ;;  %v267_v56 = vsel %vm184_vm0, %v259_v46, %v266_v50  ;;  %v2898_v57 = vperm.slane %v209_v53, %v2873_v31  ;;  %v287_v1 = vperm.slane %v279_v62, %v2873_v31 }
  0x27   : > { %v275_v59 = vperm.slane %v267_v56, %v2873_v31  ;;  %v234_v60 = vrot.slane %v219_v51, 4  ;;  %v265_v61 = vsel %vm184_vm0, %v264_v52, %v247_v41  ;;  %v2913_v15 = vpack.i.bf16 %v2833_v6, %v2826_v4 }
  0x28   : > { %2295 = vrot.lane.b32.xlu1 %v2294_v55, %s2735_s30  ;;  %v232_v63 = vrot.slane %v2898_v57, 4  ;;  %v2907_v0 = vperm.slane %v265_v61, %v2873_v31  ;;  %v238_v17 = vrot.slane %v231_v58, 4  ;;  %v294_v18 = vrot.slane %v287_v1, 4 }
  0x29   : > { %v290_v9 = vrot.slane %v275_v59, 4  ;;  %v2289_v11 = vpack.i.bf16 %v275_v59, %v219_v51  ;;  %v235_v12 = vsel %vm184_vm0, 0.0, %v234_v60  ;;  %2285 = vrot.lane.b32.xlu2 %v2913_v15, %s2734_s29  ;;  %v236_v24 = vrot.slane %v227_v47, 4 }
  0x2a   : > { %v288_v16 = vrot.slane %v2907_v0, 4  ;;  %v233_v22 = vsel %vm184_vm0, 0.0, %v232_v63  ;;  %v799_v25 = vrot.slane %v2823_v3, 1  ;;  %v798_v26 = vrot.slane %v2820_v2, 1  ;;  %v2939_v3 = vld [vmem:[%s2817_s28 + $0x58] sm:$0x3] }
  0x2b   : > { %2290 = vrot.lane.b32.xlu0 %v2289_v11, %s2736_s4  ;;  %v291_v19 = vsel %vm184_vm0, 0.0, %v290_v9  ;;  %v2927_v27 = vpack.i.bf16 %v2848_v14, %v2845_v13  ;;  %v239_v29 = vsel %vm184_vm0, 0.0, %v238_v17  ;;  %v295_v30 = vsel %vm184_vm0, 0.0, %v294_v18 }
  0x2c   : > { %v2309_v21 = vpack.i.bf16 %v291_v19, %v235_v12  ;;  %v289_v23 = vsel %vm184_vm0, 0.0, %v288_v16  ;;  %v2299_v32 = vpack.i.bf16 %v287_v1, %v231_v58  ;;  %v801_v34 = vrot.slane %v173_v20, 1 }
  0x2d   : > { %v2304_v35 = vpack.i.bf16 %v289_v23, %v233_v22  ;;  %v292_v36 = vrot.slane %v2889_v48, 4  ;;  %v803_v2 = vrot.slane %v2826_v4, 1  ;;  %v804_v37 = vrot.slane %v2833_v6, 1 }
  0x2e   : > { %v237_v38 = vsel %vm184_vm0, 0.0, %v236_v24  ;;  %v806_v39 = vrot.slane %v2930_v28, 1  ;;  %v808_v40 = vrot.slane %v2836_v7, 1  ;;  %v2948_v41 = vsel %vm797_vm1, %v798_v26, %v799_v25 }
  0x2f   : > { %v809_v42 = vrot.slane %v2839_v8, 1  ;;  %v811_v43 = vrot.slane %v2935_v33, 1  ;;  %v813_v44 = vrot.slane %v2845_v13, 1  ;;  %v2954_v45 = vsel %vm797_vm1, %v799_v25, %v801_v34 }
  0x30   : > { %2310 = vrot.lane.b32.xlu1 %v2309_v21, %s2737_s5  ;;  %v2957_v46 = vsel %vm797_vm1, %v803_v2, %v804_v37  ;;  %v814_v47 = vrot.slane %v2848_v14, 1  ;;  %v816_v48 = vrot.slane %v2939_v3, 1  ;;  %v293_v49 = vsel %vm184_vm0, 0.0, %v292_v36 }
  0x31   : > { %2300 = vrot.lane.b32.xlu2 %v2299_v32, %s2739_s7  ;;  %v2965_v50 = vsel %vm797_vm1, %v804_v37, %v806_v39  ;;  %v2968_v51 = vsel %vm797_vm1, %v808_v40, %v809_v42  ;;  %v2971_v52 = vsel %vm797_vm1, %v809_v42, %v811_v43  ;;  %v2319_v60 = vpack.i.bf16 %v295_v30, %v239_v29 }
  0x32   : > { %v2974_v53 = vsel %vm797_vm1, %v813_v44, %v814_v47  ;;  %v2977_v54 = vsel %vm797_vm1, %v814_v47, %v816_v48  ;;  %v826_v55 = vrot.slane %v2968_v51, 4  ;;  %v882_v56 = vrot.slane %v2971_v52, 4 }
  0x33   : > { %2305 = vrot.lane.b32.xlu0 %v2304_v35, %s2738_s6  ;;  %v838_v58 = vrot.slane %v2974_v53, 4  ;;  %v894_v59 = vrot.slane %v2977_v54, 4  ;;  %v2314_v61 = vpack.i.bf16 %v293_v49, %v237_v38  ;;  %v828_v18 = vrot.slane %v2948_v41, 4 }
  0x34   : > { %v827_v62 = vsel %vm184_vm0, %v826_v55, %v2948_v41  ;;  %v883_v63 = vsel %vm184_vm0, %v882_v56, %v2954_v45  ;;  %v840_v19 = vrot.slane %v2957_v46, 4  ;;  %v884_v22 = vrot.slane %v2954_v45, 4 }
  0x35   : > { %v833_v1 = vperm.slane %v827_v62, %v2842_v10  ;;  %v839_v9 = vsel %vm184_vm0, %v838_v58, %v2957_v46  ;;  %v889_v11 = vperm.slane %v883_v63, %v2842_v10  ;;  %v895_v12 = vsel %vm184_vm0, %v894_v59, %v2965_v50 }
  0x36   : > { %v845_v16 = vperm.slane %v839_v9, %v2842_v10  ;;  %v901_v17 = vperm.slane %v895_v12, %v2842_v10  ;;  %v896_v24 = vrot.slane %v2965_v50, 4  ;;  %v829_v30 = vsel %vm184_vm0, %v2968_v51, %v828_v18 }
  0x37   : > { %v852_v20 = vrot.slane %v833_v1, 4  ;;  %v908_v21 = vrot.slane %v889_v11, 4  ;;  %v885_v32 = vsel %vm184_vm0, %v2971_v52, %v884_v22  ;;  %v2324_v34 = vpack.i.bf16 %v2839_v8, %v2836_v7 }
  0x38   : > { %2330 = vrot.lane.b32.xlu1 %v2927_v27, %s2734_s29  ;;  %v841_v35 = vsel %vm184_vm0, %v2974_v53, %v840_v19  ;;  %v850_v36 = vrot.slane %v845_v16, 4  ;;  %v906_v2 = vrot.slane %v901_v17, 4  ;;  %v837_v39 = vperm.slane %v829_v30, %v2842_v10 }
  0x39   : > { %2315 = vrot.lane.b32.xlu2 %v2314_v61, %s2741_s9  ;;  %v853_v23 = vsel %vm184_vm0, %v845_v16, %v852_v20  ;;  %v909_v25 = vsel %vm184_vm0, %v901_v17, %v908_v21  ;;  %v893_v40 = vperm.slane %v885_v32, %v2842_v10  ;;  %v897_v42 = vsel %vm184_vm0, %v2977_v54, %v896_v24 }
  0x3a   : > { %v861_v26 = vperm.slane %v853_v23, %v2873_v31  ;;  %v917_v29 = vperm.slane %v909_v25, %v2873_v31  ;;  %v864_v47 = vrot.slane %v837_v39, 4  ;;  %v849_v49 = vperm.slane %v841_v35, %v2842_v10 }
  0x3b   : > { %2320 = vrot.lane.b32.xlu0 %v2319_v60, %s2740_s8  ;;  %v920_v48 = vrot.slane %v893_v40, 4  ;;  %v905_v55 = vperm.slane %v897_v42, %v2842_v10  ;;  %v851_v56 = vsel %vm184_vm0, %v850_v36, %v833_v1  ;;  %v907_v58 = vsel %vm184_vm0, %v906_v2, %v889_v11 }
  0x3c   : > { %v876_v37 = vrot.slane %v861_v26, 4  ;;  %v932_v38 = vrot.slane %v917_v29, 4  ;;  %v3033_v59 = vperm.slane %v907_v58, %v2873_v31  ;;  %v865_v61 = vsel %vm184_vm0, %v849_v49, %v864_v47 }
  0x3d   : > { %v921_v62 = vsel %vm184_vm0, %v905_v55, %v920_v48  ;;  %v862_v9 = vrot.slane %v849_v49, 4  ;;  %v918_v11 = vrot.slane %v905_v55, 4  ;;  %v873_v17 = vperm.slane %v865_v61, %v2873_v31 }
  0x3e   : > { %v877_v43 = vsel %vm184_vm0, 0.0, %v876_v37  ;;  %v933_v44 = vsel %vm184_vm0, 0.0, %v932_v38  ;;  %v930_v1 = vrot.slane %v3033_v59, 4  ;;  %v929_v18 = vperm.slane %v921_v62, %v2873_v31 }
  0x3f   : > { %v2364_v60 = vpack.i.bf16 %v933_v44, %v877_v43  ;;  %v863_v20 = vsel %vm184_vm0, %v862_v9, %v837_v39  ;;  %v919_v21 = vsel %vm184_vm0, %v918_v11, %v893_v40  ;;  %v880_v30 = vrot.slane %v873_v17, 4 }
  0x40   : > { %2340 = vrot.lane.b32.xlu1 %v2913_v15, %s2742_s10  ;;  %v3030_v15 = vperm.slane %v851_v56, %v2873_v31  ;;  %v931_v16 = vsel %vm184_vm0, 0.0, %v930_v1  ;;  %v2379_v22 = vpack.i.bf16 %v929_v18, %v873_v17  ;;  %v869_v23 = vperm.slane %v863_v20, %v2873_v31 }
  0x41   : > { %2345 = vrot.lane.b32.xlu2 %v2324_v34, %s2742_s10  ;;  %v925_v24 = vperm.slane %v919_v21, %v2873_v31  ;;  %v936_v32 = vrot.slane %v929_v18, 4  ;;  %v2359_v36 = vpack.i.bf16 %v917_v29, %v861_v26  ;;  %v2399_v42 = vpack.i.bf16 %v2971_v52, %v2968_v51 }
  0x42   : > { %v874_v63 = vrot.slane %v3030_v15, 4  ;;  %v878_v37 = vrot.slane %v869_v23, 4  ;;  %v2389_v26 = vpack.i.bf16 %v2954_v45, %v2948_v41  ;;  %v2404_v29 = vpack.i.bf16 %v2977_v54, %v2974_v53 }
  0x43   : > { %2325 = vrot.lane.b32.xlu0 %v2324_v34, %s2734_s29  ;;  %v2369_v25 = vpack.i.bf16 %v925_v24, %v869_v23  ;;  %v881_v34 = vsel %vm184_vm0, 0.0, %v880_v30  ;;  %v937_v35 = vsel %vm184_vm0, 0.0, %v936_v32  ;;  %v934_v38 = vrot.slane %v925_v24, 4 }
  0x44   : > { %v875_v12 = vsel %vm184_vm0, 0.0, %v874_v63  ;;  %v2384_v2 = vpack.i.bf16 %v937_v35, %v881_v34  ;;  %v2409_v43 = vpack.i.bf16 %v2974_v53, %v2948_v41  ;;  %v1437_v47 = vrot.slane %v2848_v14, 2 }
  0x45   : > { %v2354_v19 = vpack.i.bf16 %v931_v16, %v875_v12  ;;  %v935_v39 = vsel %vm184_vm0, 0.0, %v934_v38  ;;  %v1439_v48 = vrot.slane %v2939_v3, 2  ;;  %v1436_v49 = vrot.slane %v2845_v13, 2 }
  0x46   : > { %v1427_v13 = vrot.slane %v2833_v6, 2  ;;  %v1429_v3 = vrot.slane %v2930_v28, 2  ;;  %v1426_v41 = vrot.slane %v2826_v4, 2  ;;  %v1431_v53 = vrot.slane %v2836_v7, 2 }
  0x47   : > { %v3083_v55 = vsel %vm1420_vm2, %v1437_v47, %v1439_v48  ;;  %v3086_v56 = vsel %vm1420_vm2, %v1436_v49, %v1437_v47  ;;  %v1434_v61 = vrot.slane %v2935_v33, 2  ;;  %v2419_v7 = vpack.i.bf16 %v2957_v46, %v2977_v54 }
  0x48   : > { %2365 = vrot.lane.b32.xlu1 %v2364_v60, %s2737_s5  ;;  %v2414_v14 = vpack.i.bf16 %v3083_v55, %v3086_v56  ;;  %v1432_v60 = vrot.slane %v2839_v8, 2  ;;  %v3106_v63 = vsel %vm1420_vm2, %v1427_v13, %v1429_v3  ;;  %v3109_v1 = vsel %vm1420_vm2, %v1426_v41, %v1427_v13 }
  0x49   : > { %2355 = vrot.lane.b32.xlu2 %v2354_v19, %s2738_s6  ;;  %v2424_v4 = vpack.i.bf16 %v3106_v63, %v3109_v1 }
  0x4a   : > { %v3112_v6 = vsel %vm1420_vm2, %v1431_v53, %v1432_v60  ;;  %v3115_v28 = vsel %vm1420_vm2, %v1432_v60, %v1434_v61 }
  0x4b   : > { %2335 = vrot.lane.b32.xlu0 %v2830_v5, %s2742_s10  ;;  %v2394_v5 = vpack.i.bf16 %v2965_v50, %v2957_v46  ;;  %v2429_v8 = vpack.i.bf16 %v3115_v28, %v3112_v6 }
  0x50   : > { %2380 = vrot.lane.b32.xlu1 %v2379_v22, %s2739_s7 }
  0x51   : > { %2370 = vrot.lane.b32.xlu2 %v2369_v25, %s2735_s30 }
  0x53   : > { %2350 = vrot.lane.b32.xlu0 %v2927_v27, %s2742_s10  ;;  %v879_v27 = vsel %vm184_vm0, 0.0, %v878_v37 }
  0x54   : > { %v2374_v40 = vpack.i.bf16 %v935_v39, %v879_v27 }
  0x58   : > { %2395 = vrot.lane.b32.xlu1 %v2394_v5, %s2734_s29 }
  0x59   : > { %2385 = vrot.lane.b32.xlu2 %v2384_v2, %s2740_s8 }
  0x5b   : > { %2360 = vrot.lane.b32.xlu0 %v2359_v36, %s2736_s4 }
  0x60   : > { %1849 = vrot.lane.b32.xlu1 %v3086_v56, %s2742_s10 }
  0x61   : > { %2400 = vrot.lane.b32.xlu2 %v2399_v42, %s2734_s29 }
  0x63   : > { %2375 = vrot.lane.b32.xlu0 %v2374_v40, %s2741_s9 }
  0x68   : > { %2425 = vrot.lane.b32.xlu1 %v2424_v4, %s2734_s29 }
  0x69   : > { %2410 = vrot.lane.b32.xlu2 %v2409_v43, %s2742_s10 }
  0x6b   : > { %2390 = vrot.lane.b32.xlu0 %v2389_v26, %s2734_s29 }
  0x71   : > { %1851 = vrot.lane.b32.xlu2 %v3083_v55, %s2742_s10 }
  0x73   : > { %2405 = vrot.lane.b32.xlu0 %v2404_v29, %s2734_s29 }
  0x79   : > { %2430 = vrot.lane.b32.xlu2 %v2429_v8, %s2734_s29 }
  0x7b   : > { %2415 = vrot.lane.b32.xlu0 %v2414_v14, %s2734_s29 }
  0x83   : > { %v3077_v44 = vpop.permute.xlu2 %2285  ;;  %2420 = vrot.lane.b32.xlu0 %v2419_v7, %s2742_s10 }
  0x84   : > { %v2288_v16 = vunpack.i.h.bf16 %v3077_v44  ;;  %v2287_v38 = vunpack.i.l.bf16 %v3077_v44 }
  0x86   : > { %v475_v39 = vrot.slane %v2288_v16, 4  ;;  %v419_v47 = vrot.slane %v2287_v38, 4 }
  0x8b   : > { %v3103_v62 = vpop.permute.xlu2 %2300 }
  0x8c   : > { %v2303_v3 = vunpack.i.h.bf16 %v3103_v62  ;;  %v2302_v41 = vunpack.i.l.bf16 %v3103_v62 }
  0x8f   : > { %v3088_v58 = vpop.permute.xlu1 %2280 }
  0x90   : > { %v2283_v29 = vunpack.i.h.bf16 %v3088_v58  ;;  %v2282_v43 = vunpack.i.l.bf16 %v3088_v58 }
  0x92   : > { %v463_v60 = vrot.slane %v2283_v29, 4  ;;  %v407_v58 = vrot.slane %v2282_v43, 4 }
  0x93   : > { %v2316_v11 = vpop.permute.xlu2 %2315 }
  0x94   : > { %v2318_v32 = vunpack.i.h.bf16 %v2316_v11  ;;  %v2317_v5 = vunpack.i.l.bf16 %v2316_v11 }
  0x9a   : > { %v2296_v33 = vpop.permute.xlu1 %2295 }
  0x9b   : > { %v2298_v20 = vunpack.i.h.bf16 %v2296_v33  ;;  %v2297_v21 = vunpack.i.l.bf16 %v2296_v33  ;;  %v3127_v24 = vpop.permute.xlu2 %2345 }
  0x9c   : > { %v2348_v14 = vunpack.i.h.bf16 %v3127_v24  ;;  %v2347_v13 = vunpack.i.l.bf16 %v3127_v24 }
  0x9d   : > { %v2291_v9 = vpop.permute.xlu0 %2290 }
  0x9e   : > { %v2293_v22 = vunpack.i.h.bf16 %v2291_v9  ;;  %v2292_v23 = vunpack.i.l.bf16 %v2291_v9  ;;  %v667_v9 = vrot.slane %v2348_v14, 4  ;;  %v611_v62 = vrot.slane %v2347_v13, 4 }
  0xa2   : > { %v2311_v12 = vpop.permute.xlu1 %2310 }
  0xa3   : > { %v2313_v46 = vunpack.i.h.bf16 %v2311_v12  ;;  %v2312_v54 = vunpack.i.l.bf16 %v2311_v12  ;;  %v3149_v53 = vpop.permute.xlu2 %2355 }
  0xa4   : > { %v2358_v61 = vunpack.i.h.bf16 %v3149_v53  ;;  %v2357_v11 = vunpack.i.l.bf16 %v3149_v53 }
  0xa5   : > { %v2306_v17 = vpop.permute.xlu0 %2305 }
  0xa6   : > { %v2308_v18 = vunpack.i.h.bf16 %v2306_v17  ;;  %v2307_v19 = vunpack.i.l.bf16 %v2306_v17 }
  0xa8   : > { %v366_v25 = vsel %vm352_vm3, %v2907_v0, %v2308_v18  ;;  %v353_v30 = vsel %vm352_vm3, %v2898_v57, %v2307_v19 }
  0xa9   : > { %v367_v34 = vsel %vm354_vm4, %v366_v25, %v2293_v22  ;;  %v355_v35 = vsel %vm354_vm4, %v353_v30, %v2292_v23 }
  0xaa   : > { %v357_v36 = vsel %vm356_vm5, %v355_v35, %v2312_v54  ;;  %v368_v2 = vsel %vm356_vm5, %v367_v34, %v2313_v46  ;;  %v2331_v37 = vpop.permute.xlu1 %2330 }
  0xab   : > { %v359_v27 = vsel %vm358_vm6, %v357_v36, %v2297_v21  ;;  %v369_v0 = vsel %vm358_vm6, %v368_v2, %v2298_v20  ;;  %v2333_v42 = vunpack.i.h.bf16 %v2331_v37  ;;  %v2332_v48 = vunpack.i.l.bf16 %v2331_v37 }
  0xac   : > { %v361_v57 = vsel %vm360_vm7, %v359_v27, %v2317_v5  ;;  %v370_v40 = vsel %vm360_vm7, %v369_v0, %v2318_v32 }
  0xad   : > { %v2321_v26 = vpop.permute.xlu0 %2320  ;;  %v473_v49 = vrot.slane %v2333_v42, 4  ;;  %v476_v44 = vsel %vm184_vm0, %v2333_v42, %v475_v39  ;;  %v417_v7 = vrot.slane %v2332_v48, 4  ;;  %v420_v8 = vsel %vm184_vm0, %v2332_v48, %v419_v47 }
  0xae   : > { %v484_v4 = vperm.slane %v476_v44, %v2842_v10  ;;  %v2323_v12 = vunpack.i.h.bf16 %v2321_v26  ;;  %v2322_v17 = vunpack.i.l.bf16 %v2321_v26  ;;  %v363_v54 = vsel %vm362_vm8, %v361_v57, %v2302_v41 }
  0xaf   : > { %v474_v33 = vsel %vm184_vm0, %v473_v49, %v2288_v16  ;;  %v371_v18 = vsel %vm362_vm8, %v370_v40, %v2303_v3  ;;  %v428_v19 = vperm.slane %v420_v8, %v2842_v10  ;;  %v3165_v16 = vsel %vm352_vm3, %v3033_v59, %v2358_v61 }
  0xb0   : > { %v3168_v22 = vperm.slane %v474_v33, %v2842_v10  ;;  %v497_v23 = vrot.slane %v484_v4, 4  ;;  %v418_v25 = vsel %vm184_vm0, %v417_v7, %v2287_v38  ;;  %v3178_v59 = vsel %vm364_vm9, %v363_v54, %v2322_v17 }
  0xb1   : > { %v3181_v37 = vsel %vm364_vm9, %v371_v18, %v2323_v12  ;;  %v3184_v38 = vperm.slane %v418_v25, %v2842_v10  ;;  %v441_v27 = vrot.slane %v428_v19, 4 }
  0xb2   : > { %v3175_v2 = vpop.permute.xlu1 %2340 }
  0xb3   : > { %v2343_v49 = vunpack.i.h.bf16 %v3175_v2  ;;  %v2342_v44 = vunpack.i.l.bf16 %v3175_v2  ;;  %v429_v2 = vrot.slane %v3184_v38, 4 }
  0xb5   : > { %v2326_v46 = vpop.permute.xlu0 %2325 }
  0xb6   : > { %v2328_v20 = vunpack.i.h.bf16 %v2326_v46  ;;  %v2327_v21 = vunpack.i.l.bf16 %v2326_v46 }
  0xb8   : > { %v461_v30 = vrot.slane %v2328_v20, 4  ;;  %v464_v32 = vsel %vm184_vm0, %v2328_v20, %v463_v60  ;;  %v405_v5 = vrot.slane %v2327_v21, 4  ;;  %v408_v34 = vsel %vm184_vm0, %v2327_v21, %v407_v58  ;;  %v3220_v20 = vpop.permute.xlu2 %2370 }
  0xb9   : > { %v472_v35 = vperm.slane %v464_v32, %v2842_v10  ;;  %v416_v36 = vperm.slane %v408_v34, %v2842_v10  ;;  %v2372_v24 = vunpack.i.l.bf16 %v3220_v20 }
  0xba   : > { %v462_v0 = vsel %vm184_vm0, %v461_v30, %v2283_v29  ;;  %v406_v39 = vsel %vm184_vm0, %v405_v5, %v2282_v43  ;;  %v3244_v5 = vpop.permute.xlu1 %2365 }
  0xbb   : > { %v3189_v57 = vperm.slane %v462_v0, %v2842_v10  ;;  %v499_v40 = vrot.slane %v472_v35, 4  ;;  %v3192_v42 = vperm.slane %v406_v39, %v2842_v10  ;;  %v443_v26 = vrot.slane %v416_v36, 4 }
  0xbc   : > { %v442_v47 = vsel %vm184_vm0, %v441_v27, %v416_v36  ;;  %v498_v48 = vsel %vm184_vm0, %v497_v23, %v472_v35  ;;  %v3230_v23 = vsel %vm352_vm3, %v3030_v15, %v2357_v11  ;;  %v625_v35 = vrot.slane %v2342_v44, 4 }
  0xbd   : > { %v487_v29 = vrot.slane %v3189_v57, 4  ;;  %v431_v43 = vrot.slane %v3192_v42, 4  ;;  %v2336_v3 = vpop.permute.xlu0 %2335  ;;  %v3201_v41 = vperm.slane %v442_v47, %v2873_v31  ;;  %v3204_v53 = vperm.slane %v498_v48, %v2873_v31 }
  0xbe   : > { %v2338_v60 = vunpack.i.h.bf16 %v2336_v3  ;;  %v2337_v61 = vunpack.i.l.bf16 %v2336_v3  ;;  %v444_v58 = vsel %vm184_vm0, %v428_v19, %v443_v26  ;;  %v500_v7 = vsel %vm184_vm0, %v484_v4, %v499_v40 }
  0xbf   : > { %v2439_v8 = vpack.i.bf16 %v3204_v53, %v3201_v41  ;;  %v3211_v33 = vperm.slane %v444_v58, %v2873_v31  ;;  %v3214_v12 = vperm.slane %v500_v7, %v2873_v31  ;;  %v432_v17 = vsel %vm184_vm0, %v3184_v38, %v431_v43 }
  0xc0   : > { %v668_v46 = vsel %vm184_vm0, %v667_v9, %v2338_v60  ;;  %v669_v54 = vrot.slane %v2338_v60, 4  ;;  %v612_v18 = vsel %vm184_vm0, %v611_v62, %v2337_v61  ;;  %v613_v19 = vrot.slane %v2337_v61, 4 }
  0xc1   : > { %v3223_v4 = vperm.slane %v668_v46, %v2842_v10  ;;  %2440 = vrot.lane.b32.xlu2 %v2439_v8, %s2735_s30  ;;  %v2444_v21 = vpack.i.bf16 %v3214_v12, %v3211_v33  ;;  %v2373_v9 = vunpack.i.h.bf16 %v3220_v20  ;;  %v3240_v30 = vperm.slane %v432_v17, %v2873_v31 }
  0xc2   : > { %v670_v62 = vsel %vm184_vm0, %v2348_v14, %v669_v54  ;;  %v614_v25 = vsel %vm184_vm0, %v2347_v13, %v613_v19  ;;  %v488_v32 = vsel %vm184_vm0, %v3168_v22, %v487_v29  ;;  %v3248_v11 = vperm.slane %v612_v18, %v2842_v10 }
  0xc3   : > { %v678_v15 = vperm.slane %v670_v62, %v2842_v10  ;;  %v622_v34 = vperm.slane %v614_v25, %v2842_v10  ;;  %2445 = vrot.lane.b32.xlu1 %v2444_v21, %s2739_s7  ;;  %v485_v14 = vrot.slane %v3168_v22, 4  ;;  %v681_v13 = vrot.slane %v2343_v49, 4 }
  0xc4   : > { %v3255_v36 = vperm.slane %v488_v32, %v2873_v31  ;;  %v2368_v0 = vunpack.i.h.bf16 %v3244_v5  ;;  %v2367_v39 = vunpack.i.l.bf16 %v3244_v5  ;;  %v457_v40 = vrot.slane %v3201_v41, 4 }
  0xc5   : > { %v2351_v27 = vpop.permute.xlu0 %2350  ;;  %v693_v26 = vrot.slane %v3223_v4, 4  ;;  %v705_v29 = vrot.slane %v678_v15, 4  ;;  %v637_v43 = vrot.slane %v3248_v11, 4  ;;  %v649_v3 = vrot.slane %v622_v34, 4 }
  0xc6   : > { %v2434_v47 = vpack.i.bf16 %v3255_v36, %v3240_v30  ;;  %v2353_v22 = vunpack.i.h.bf16 %v2351_v27  ;;  %v2352_v48 = vunpack.i.l.bf16 %v2351_v27  ;;  %v513_v38 = vrot.slane %v3204_v53, 4 }
  0xc7   : > { %v430_v17 = vsel %vm184_vm0, %v429_v2, %v3192_v42  ;;  %v486_v46 = vsel %vm184_vm0, %v485_v14, %v3189_v57  ;;  %v455_v18 = vrot.slane %v3240_v30, 4  ;;  %v511_v19 = vrot.slane %v3255_v36, 4 }
  0xc8   : > { %2435 = vrot.lane.b32.xlu0 %v2434_v47, %s2736_s4  ;;  %v679_v60 = vrot.slane %v2353_v22, 4  ;;  %v682_v61 = vsel %vm184_vm0, %v2353_v22, %v681_v13  ;;  %v623_v58 = vrot.slane %v2352_v48, 4  ;;  %v626_v41 = vsel %vm184_vm0, %v2352_v48, %v625_v35  ;;  %v3283_v13 = vpop.permute.xlu2 %2385 }
  0xc9   : > { %v690_v7 = vperm.slane %v682_v61, %v2842_v10  ;;  %v634_v8 = vperm.slane %v626_v41, %v2842_v10  ;;  %v3286_v57 = vperm.slane %v430_v17, %v2873_v31  ;;  %v514_v17 = vsel %vm184_vm0, 0.0, %v513_v38 }
  0xca   : > { %v680_v53 = vsel %vm184_vm0, %v679_v60, %v2343_v49  ;;  %v624_v54 = vsel %vm184_vm0, %v623_v58, %v2342_v44  ;;  %v3289_v49 = vperm.slane %v486_v46, %v2873_v31  ;;  %v456_v46 = vsel %vm184_vm0, 0.0, %v455_v18 }
  0xcb   : > { %v686_v21 = vperm.slane %v680_v53, %v2842_v10  ;;  %v703_v62 = vrot.slane %v690_v7, 4  ;;  %v630_v25 = vperm.slane %v624_v54, %v2842_v10  ;;  %v647_v32 = vrot.slane %v634_v8, 4 }
  0xcc   : > { %v650_v5 = vsel %vm184_vm0, %v634_v8, %v649_v3  ;;  %v706_v42 = vsel %vm184_vm0, %v690_v7, %v705_v29  ;;  %v453_v53 = vrot.slane %v3286_v57, 4  ;;  %v512_v54 = vsel %vm184_vm0, 0.0, %v511_v19 }
  0xcd   : > { %v691_v44 = vrot.slane %v686_v21, 4  ;;  %v635_v30 = vrot.slane %v630_v25, 4  ;;  %v2361_v14 = vpop.permute.xlu0 %2360  ;;  %v3292_v35 = vperm.slane %v650_v5, %v2873_v31  ;;  %v3295_v36 = vperm.slane %v706_v42, %v2873_v31 }
  0xce   : > { %v2363_v2 = vunpack.i.h.bf16 %v2361_v14  ;;  %v2362_v27 = vunpack.i.l.bf16 %v2361_v14  ;;  %v648_v47 = vsel %vm184_vm0, %v647_v32, %v622_v34  ;;  %v704_v22 = vsel %vm184_vm0, %v703_v62, %v678_v15 }
  0xcf   : > { %v2459_v48 = vpack.i.bf16 %v3295_v36, %v3292_v35  ;;  %v3302_v29 = vperm.slane %v648_v47, %v2873_v31  ;;  %v3305_v3 = vperm.slane %v704_v22, %v2873_v31  ;;  %v638_v60 = vsel %vm184_vm0, %v630_v25, %v637_v43 }
  0xd0   : > { %v1002_v61 = vsel %vm354_vm4, %v3165_v16, %v2363_v2  ;;  %v995_v58 = vsel %vm354_vm4, %v3230_v23, %v2362_v27  ;;  %v646_v34 = vperm.slane %v638_v60, %v2873_v31  ;;  %v694_v15 = vsel %vm184_vm0, %v686_v21, %v693_v26  ;;  %v2381_v26 = vpop.permute.xlu1 %2380  ;;  %v2401_v32 = vpop.permute.xlu2 %2400 }
  0xd1   : > { %v996_v41 = vsel %vm356_vm5, %v995_v58, %v2367_v39  ;;  %v1003_v7 = vsel %vm356_vm5, %v1002_v61, %v2368_v0  ;;  %2460 = vrot.lane.b32.xlu0 %v2459_v48, %s2739_s7  ;;  %v2454_v8 = vpack.i.bf16 %v3305_v3, %v3302_v29  ;;  %v702_v43 = vperm.slane %v694_v15, %v2873_v31 }
  0xd2   : > { %v997_v16 = vsel %vm358_vm6, %v996_v41, %v2372_v24  ;;  %v1004_v23 = vsel %vm358_vm6, %v1003_v7, %v2373_v9  ;;  %v458_v39 = vsel %vm184_vm0, 0.0, %v457_v40  ;;  %v509_v24 = vrot.slane %v3289_v49, 4 }
  0xd3   : > { %2455 = vrot.lane.b32.xlu1 %v2454_v8, %s2735_s30  ;;  %v2449_v0 = vpack.i.bf16 %v702_v43, %v646_v34  ;;  %v636_v20 = vsel %vm184_vm0, %v635_v30, %v3248_v11  ;;  %v692_v9 = vsel %vm184_vm0, %v691_v44, %v3223_v4  ;;  %v2383_v21 = vunpack.i.h.bf16 %v2381_v26 }
  0xd4   : > { %v2382_v62 = vunpack.i.l.bf16 %v2381_v26  ;;  %v2474_v18 = vpack.i.bf16 %v514_v17, %v458_v39  ;;  %v3339_v5 = vperm.slane %v636_v20, %v2873_v31  ;;  %v2469_v19 = vpack.i.bf16 %v512_v54, %v456_v46 }
  0xd5   : > { %2450 = vrot.lane.b32.xlu2 %v2449_v0, %s2736_s4  ;;  %v2376_v40 = vpop.permute.xlu0 %2375  ;;  %v454_v42 = vsel %vm184_vm0, 0.0, %v453_v53  ;;  %v661_v14 = vrot.slane %v646_v34, 4  ;;  %v3343_v11 = vperm.slane %v692_v9, %v2873_v31  ;;  %v510_v30 = vsel %vm184_vm0, 0.0, %v509_v24 }
  0xd6   : > { %v2378_v38 = vunpack.i.h.bf16 %v2376_v40  ;;  %v2377_v25 = vunpack.i.l.bf16 %v2376_v40  ;;  %v717_v2 = vrot.slane %v702_v43, 4  ;;  %v2403_v22 = vunpack.i.h.bf16 %v2401_v32 }
  0xd7   : > { %v2402_v48 = vunpack.i.l.bf16 %v2401_v32  ;;  %v659_v60 = vrot.slane %v3339_v5, 4  ;;  %v715_v61 = vrot.slane %v3343_v11, 4  ;;  %v2464_v58 = vpack.i.bf16 %v510_v30, %v454_v42 }
  0xd8   : > { %v998_v4 = vsel %vm360_vm7, %v997_v16, %v2377_v25  ;;  %v1005_v44 = vsel %vm360_vm7, %v1004_v23, %v2378_v38  ;;  %v459_v34 = vrot.slane %v3211_v33, 4  ;;  %v515_v15 = vrot.slane %v3214_v12, 4  ;;  %v2396_v8 = vpop.permute.xlu1 %2395 }
  0xd9   : > { %v999_v27 = vsel %vm362_vm8, %v998_v4, %v2382_v62  ;;  %v1006_v47 = vsel %vm362_vm8, %v1005_v44, %v2383_v21  ;;  %2475 = vrot.lane.b32.xlu0 %v2474_v18, %s2741_s9  ;;  %v662_v41 = vsel %vm184_vm0, 0.0, %v661_v14  ;;  %v718_v7 = vsel %vm184_vm0, 0.0, %v717_v2 }
  0xda   : > { %v2388_v43 = vunpack.i.h.bf16 %v3283_v13  ;;  %v2387_v16 = vunpack.i.l.bf16 %v3283_v13  ;;  %v1088_v23 = vrot.slane %v2403_v22, 4  ;;  %v1032_v26 = vrot.slane %v2402_v48, 4 }
  0xdb   : > { %2470 = vrot.lane.b32.xlu1 %v2469_v19, %s2737_s5  ;;  %v660_v33 = vsel %vm184_vm0, 0.0, %v659_v60  ;;  %v716_v12 = vsel %vm184_vm0, 0.0, %v715_v61  ;;  %v2489_v46 = vpack.i.bf16 %v718_v7, %v662_v41  ;;  %v460_v53 = vsel %vm184_vm0, 0.0, %v459_v34 }
  0xdc   : > { %v516_v54 = vsel %vm184_vm0, 0.0, %v515_v15  ;;  %v2398_v24 = vunpack.i.h.bf16 %v2396_v8  ;;  %v2397_v13 = vunpack.i.l.bf16 %v2396_v8  ;;  %v665_v40 = vrot.slane %v3292_v35, 4 }
  0xdd   : > { %2465 = vrot.lane.b32.xlu2 %v2464_v58, %s2738_s6  ;;  %v2391_v39 = vpop.permute.xlu0 %2390  ;;  %v2484_v21 = vpack.i.bf16 %v716_v12, %v660_v33  ;;  %v721_v62 = vrot.slane %v3295_v36, 4  ;;  %v663_v38 = vrot.slane %v3302_v29, 4  ;;  %v719_v25 = vrot.slane %v3305_v3, 4 }
  0xde   : > { %v2393_v0 = vunpack.i.h.bf16 %v2391_v39  ;;  %v2392_v17 = vunpack.i.l.bf16 %v2391_v39  ;;  %v3371_v18 = vsel %vm364_vm9, %v999_v27, %v2387_v16  ;;  %v3374_v32 = vsel %vm364_vm9, %v1006_v47, %v2388_v43 }
  0xdf   : > { %v2479_v35 = vpack.i.bf16 %v516_v54, %v460_v53  ;;  %v1102_v29 = vrot.slane %v2398_v24, 4  ;;  %v1046_v4 = vrot.slane %v2397_v13, 4  ;;  %v666_v44 = vsel %vm184_vm0, 0.0, %v665_v40 }
  0xe0   : > { %v1090_v20 = vrot.slane %v2393_v0, 4  ;;  %v1034_v9 = vrot.slane %v2392_v17, 4  ;;  %v1089_v14 = vsel %vm184_vm0, %v1088_v23, %v2393_v0  ;;  %v1033_v36 = vsel %vm184_vm0, %v1032_v26, %v2392_v17 }
  0xe1   : > { %2490 = vrot.lane.b32.xlu0 %v2489_v46, %s2737_s5  ;;  %v722_v30 = vsel %vm184_vm0, 0.0, %v721_v62  ;;  %v664_v2 = vsel %vm184_vm0, 0.0, %v663_v38  ;;  %v720_v27 = vsel %vm184_vm0, 0.0, %v719_v25  ;;  %v1095_v61 = vperm.slane %v1089_v14, %v2842_v10 }
  0xe2   : > { %v1091_v19 = vsel %vm184_vm0, %v2403_v22, %v1090_v20  ;;  %v1035_v42 = vsel %vm184_vm0, %v2402_v48, %v1034_v9  ;;  %v1039_v58 = vperm.slane %v1033_v36, %v2842_v10  ;;  %v2499_v16 = vpack.i.bf16 %v722_v30, %v666_v44 }
  0xe3   : > { %2485 = vrot.lane.b32.xlu1 %v2484_v21, %s2738_s6  ;;  %v1099_v47 = vperm.slane %v1091_v19, %v2842_v10  ;;  %v1043_v22 = vperm.slane %v1035_v42, %v2842_v10  ;;  %v2494_v23 = vpack.i.bf16 %v720_v27, %v664_v2  ;;  %v1114_v54 = vrot.slane %v1095_v61, 4 }
  0xe4   : > { %v1058_v20 = vrot.slane %v1039_v58, 4 }
  0xe5   : > { %2480 = vrot.lane.b32.xlu2 %v2479_v35, %s2740_s8  ;;  %v2406_v3 = vpop.permute.xlu0 %2405  ;;  %v1126_v26 = vrot.slane %v1099_v47, 4  ;;  %v1070_v39 = vrot.slane %v1043_v22, 4 }
  0xe6   : > { %v2408_v48 = vunpack.i.h.bf16 %v2406_v3  ;;  %v2407_v60 = vunpack.i.l.bf16 %v2406_v3 }
  0xe8   : > { %v1100_v34 = vrot.slane %v2408_v48, 4  ;;  %v1103_v15 = vsel %vm184_vm0, %v2408_v48, %v1102_v29  ;;  %v1044_v41 = vrot.slane %v2407_v60, 4  ;;  %v1047_v7 = vsel %vm184_vm0, %v2407_v60, %v1046_v4 }
  0xe9   : > { %v1111_v8 = vperm.slane %v1103_v15, %v2842_v10  ;;  %v1055_v43 = vperm.slane %v1047_v7, %v2842_v10 }
  0xea   : > { %v1101_v0 = vsel %vm184_vm0, %v1100_v34, %v2398_v24  ;;  %v1045_v17 = vsel %vm184_vm0, %v1044_v41, %v2397_v13 }
  0xeb   : > { %v1107_v33 = vperm.slane %v1101_v0, %v2842_v10  ;;  %v1124_v12 = vrot.slane %v1111_v8, 4  ;;  %v1051_v46 = vperm.slane %v1045_v17, %v2842_v10  ;;  %v1068_v53 = vrot.slane %v1055_v43, 4  ;;  %2500 = vrot.lane.b32.xlu1 %v2499_v16, %s2740_s8 }
  0xec   : > { %v1071_v9 = vsel %vm184_vm0, %v1055_v43, %v1070_v39  ;;  %v1127_v40 = vsel %vm184_vm0, %v1111_v8, %v1126_v26 }
  0xed   : > { %v1112_v21 = vrot.slane %v1107_v33, 4  ;;  %v1056_v62 = vrot.slane %v1051_v46, 4  ;;  %2495 = vrot.lane.b32.xlu2 %v2494_v23, %s2741_s9  ;;  %v1079_v24 = vperm.slane %v1071_v9, %v2873_v31  ;;  %v1135_v13 = vperm.slane %v1127_v40, %v2873_v31  ;;  %v2666_v40 = vld [vmem:[%s2817_s28 + $0x8] sm:$0xff] }
  0xee   : > { %v1069_v38 = vsel %vm184_vm0, %v1068_v53, %v1043_v22  ;;  %v1125_v25 = vsel %vm184_vm0, %v1124_v12, %v1099_v47  ;;  %v1059_v19 = vsel %vm184_vm0, %v1051_v46, %v1058_v20  ;;  %v1115_v42 = vsel %vm184_vm0, %v1107_v33, %v1114_v54  ;;  %v3438_v53 = vpop.permute.xlu1 %1849  ;;  %v2416_v54 = vpop.permute.xlu0 %2415  ;;  %v2665_v20 = vld [vmem:[%s2817_s28] sm:$0xff] }
  0xef   : > { %v2514_v35 = vpack.i.bf16 %v1135_v13, %v1079_v24  ;;  %v1075_v14 = vperm.slane %v1069_v38, %v2873_v31  ;;  %v1131_v36 = vperm.slane %v1125_v25, %v2873_v31  ;;  %v1067_v29 = vperm.slane %v1059_v19, %v2873_v31 }
  0xf0   : > { %v1123_v4 = vperm.slane %v1115_v42, %v2873_v31  ;;  %v1057_v3 = vsel %vm184_vm0, %v1056_v62, %v1039_v58  ;;  %v1113_v44 = vsel %vm184_vm0, %v1112_v21, %v1095_v61  ;;  %v1086_v39 = vrot.slane %v1079_v24, 4  ;;  %v2667_v62 = vld [vmem:[%s2817_s28 + $0x10] sm:$0x3] }
  0xf1   : > { %2515 = vrot.lane.b32.xlu0 %v2514_v35, %s2739_s7  ;;  %v2509_v30 = vpack.i.bf16 %v1131_v36, %v1075_v14  ;;  %v1082_v2 = vrot.slane %v1067_v29, 4  ;;  %v3416_v27 = vperm.slane %v1057_v3, %v2873_v31  ;;  %v3419_v47 = vperm.slane %v1113_v44, %v2873_v31 }
  0xf2   : > { %v2504_v22 = vpack.i.bf16 %v1123_v4, %v1067_v29  ;;  %v1138_v48 = vrot.slane %v1123_v4, 4  ;;  %v1084_v15 = vrot.slane %v1075_v14, 4  ;;  %v1140_v41 = vrot.slane %v1131_v36, 4 }
  0xf3   : > { %2510 = vrot.lane.b32.xlu1 %v2509_v30, %s2735_s30  ;;  %v1080_v60 = vrot.slane %v3416_v27, 4  ;;  %v1136_v58 = vrot.slane %v3419_v47, 4  ;;  %v1083_v61 = vsel %vm184_vm0, 0.0, %v1082_v2  ;;  %v1142_v0 = vrot.slane %v1135_v13, 4  ;;  %v3446_v13 = vpop.permute.xlu2 %2410 }
  0xf4   : > { %v1139_v34 = vsel %vm184_vm0, 0.0, %v1138_v48  ;;  %v1085_v16 = vsel %vm184_vm0, 0.0, %v1084_v15  ;;  %v1141_v23 = vsel %vm184_vm0, 0.0, %v1140_v41  ;;  %v1087_v33 = vsel %vm184_vm0, 0.0, %v1086_v39 }
  0xf5   : > { %2505 = vrot.lane.b32.xlu2 %v2504_v22, %s2736_s4  ;;  %v1081_v7 = vsel %vm184_vm0, 0.0, %v1080_v60  ;;  %v1137_v8 = vsel %vm184_vm0, 0.0, %v1136_v58  ;;  %v2524_v43 = vpack.i.bf16 %v1139_v34, %v1083_v61  ;;  %v2529_v17 = vpack.i.bf16 %v1141_v23, %v1085_v16 }
  0xf6   : > { %v2519_v26 = vpack.i.bf16 %v1137_v8, %v1081_v7  ;;  %v1143_v12 = vsel %vm184_vm0, 0.0, %v1142_v0  ;;  %v1421_v9 = vrot.slane %v2665_v20, 2  ;;  %v1422_v21 = vrot.slane %v2666_v40, 2  ;;  %v2426_v3 = vpop.permute.xlu1 %2425  ;;  %v3461_v44 = vpop.permute.xlu0 %2420 }
  0xf7   : > { %v2534_v46 = vpack.i.bf16 %v1143_v12, %v1087_v33  ;;  %v1424_v24 = vrot.slane %v2667_v62, 2  ;;  %v2418_v38 = vunpack.i.h.bf16 %v2416_v54  ;;  %v2417_v25 = vunpack.i.l.bf16 %v2416_v54 }
  0xf8   : > { %v2413_v19 = vunpack.i.h.bf16 %v3446_v13  ;;  %v2544_v42 = vpack.i.bf16 %v2954_v45, %v2971_v52  ;;  %v3454_v35 = vsel %vm1420_vm2, %v1421_v9, %v1422_v21  ;;  %v2428_v45 = vunpack.i.h.bf16 %v2426_v3 }
  0xf9   : > { %2525 = vrot.lane.b32.xlu0 %v2524_v43, %s2737_s5  ;;  %v3457_v14 = vsel %vm1420_vm2, %v1422_v21, %v1424_v24  ;;  %v1723_v36 = vrot.slane %v2418_v38, 4  ;;  %v1667_v29 = vrot.slane %v2417_v25, 4  ;;  %v2427_v52 = vunpack.i.l.bf16 %v2426_v3 }
  0xfa   : > { %v1250_v4 = vrot.slane %v2413_v19, 4  ;;  %v2549_v30 = vpack.i.bf16 %v3457_v14, %v3454_v35  ;;  %v2423_v2 = vunpack.i.h.bf16 %v3461_v44  ;;  %v2539_v22 = vpack.i.bf16 %v2968_v51, %v2965_v50 }
  0xfb   : > { %2520 = vrot.lane.b32.xlu1 %v2519_v26, %s2738_s6  ;;  %v1725_v48 = vrot.slane %v2428_v45, 4  ;;  %v3470_v60 = vsel %vm184_vm0, %v1667_v29, %v2427_v52  ;;  %v1669_v58 = vrot.slane %v2427_v52, 4  ;;  %v3473_v61 = vsel %vm184_vm0, %v1723_v36, %v2428_v45  ;;  %v3485_v50 = vpop.permute.xlu2 %1851 }
  0xfc   : > { %v3476_v34 = vsel %vm184_vm0, %v1250_v4, %v2423_v2  ;;  %v1252_v15 = vrot.slane %v2423_v2, 4 }
  0xfd   : > { %2530 = vrot.lane.b32.xlu2 %v2529_v17, %s2741_s9  ;;  %v3480_v41 = vsel %vm184_vm0, %v2417_v25, %v1669_v58  ;;  %v3483_v7 = vsel %vm184_vm0, %v2418_v38, %v1725_v48 }
  0xfe   : > { %v3489_v51 = vsel %vm184_vm0, %v2413_v19, %v1252_v15 }
 0x101   : > { %1841 = vrot.lane.b32.xlu0 %v3109_v1, %s2742_s10 }
 0x103   : > { %2535 = vrot.lane.b32.xlu1 %v2534_v46, %s2740_s8  ;;  %v3495_v8 = vpop.permute.xlu2 %2430 }
 0x105   : > { %1845 = vrot.lane.b32.xlu2 %v3112_v6, %s2742_s10 }
 0x109   : > { %1847 = vrot.lane.b32.xlu0 %v3115_v28, %s2742_s10 }
 0x10b   : > { %1843 = vrot.lane.b32.xlu1 %v3106_v63, %s2742_s10 }
 0x10d   : > { %2545 = vrot.lane.b32.xlu2 %v2544_v42, %s2742_s10 }
 0x111   : > { %2550 = vrot.lane.b32.xlu0 %v2549_v30, %s2734_s29  ;;  %s2147_s29 = scalar_lea.hbm %s4279_s3, %s2226_s26 }
 0x113   : > { %2540 = vrot.lane.b32.xlu1 %v2539_v22, %s2742_s10 }
 0x115   : > { %1839 = vrot.lane.b32.xlu2 %v3457_v14, %s2742_s10 }
 0x11b   : > { %1837 = vrot.lane.b32.xlu1 %v3454_v35, %s2742_s10  ;;  %v2441_v43 = vpop.permute.xlu2 %2440  ;;  %s2688_s10 = scalar_lea.hbm %s4279_s3, 32 }
 0x11c   : > { %v2443_v42 = vunpack.i.h.bf16 %v2441_v43  ;;  %v2442_v36 = vunpack.i.l.bf16 %v2441_v43 }
 0x12f   : > { %v2451_v16 = vpop.permute.xlu2 %2450 }
 0x130   : > { %v2453_v45 = vunpack.i.h.bf16 %v2451_v16  ;;  %v2452_v52 = vunpack.i.l.bf16 %v2451_v16 }
 0x135   : > { %v2446_v54 = vpop.permute.xlu1 %2445 }
 0x136   : > { %v2448_v48 = vunpack.i.h.bf16 %v2446_v54  ;;  %v2447_v58 = vunpack.i.l.bf16 %v2446_v54 }
 0x137   : > { %v2466_v23 = vpop.permute.xlu2 %2465 }
 0x138   : > { %v2468_v26 = vunpack.i.h.bf16 %v2466_v23  ;;  %v2467_v39 = vunpack.i.l.bf16 %v2466_v23 }
 0x13a   : > { %v580_v0 = vsel %vm352_vm3, %v3289_v49, %v2468_v26  ;;  %v573_v17 = vsel %vm352_vm3, %v3286_v57, %v2467_v39  ;;  %v2436_v33 = vpop.permute.xlu0 %2435 }
 0x13b   : > { %v2438_v12 = vunpack.i.h.bf16 %v2436_v33  ;;  %v2437_v46 = vunpack.i.l.bf16 %v2436_v33 }
 0x13d   : > { %v574_v20 = vsel %vm354_vm4, %v573_v17, %v2437_v46  ;;  %v581_v9 = vsel %vm354_vm4, %v580_v0, %v2438_v12 }
 0x13f   : > { %v2481_v40 = vpop.permute.xlu2 %2480 }
 0x140   : > { %v2483_v26 = vunpack.i.h.bf16 %v2481_v40  ;;  %v2482_v43 = vunpack.i.l.bf16 %v2481_v40 }
 0x143   : > { %v3503_v21 = vpop.permute.xlu0 %2460 }
 0x145   : > { %v2456_v62 = vpop.permute.xlu1 %2455 }
 0x147   : > { %v2496_v24 = vpop.permute.xlu2 %2495 }
 0x14b   : > { %v2476_v38 = vpop.permute.xlu0 %2475 }
 0x14c   : > { %v2478_v39 = vunpack.i.h.bf16 %v2476_v38  ;;  %v2477_v0 = vunpack.i.l.bf16 %v2476_v38 }
 0x14d   : > { %v2471_v25 = vpop.permute.xlu1 %2470 }
 0x14e   : > { %v2473_v19 = vunpack.i.h.bf16 %v2471_v25  ;;  %v2472_v49 = vunpack.i.l.bf16 %v2471_v25 }
 0x14f   : > { %v3509_v30 = vpop.permute.xlu2 %2505 }
 0x150   : > { %v575_v57 = vsel %vm356_vm5, %v574_v20, %v2472_v49  ;;  %v582_v29 = vsel %vm356_vm5, %v581_v9, %v2473_v19 }
 0x151   : > { %v576_v4 = vsel %vm358_vm6, %v575_v57, %v2442_v36  ;;  %v583_v3 = vsel %vm358_vm6, %v582_v29, %v2443_v42 }
 0x152   : > { %v577_v54 = vsel %vm360_vm7, %v576_v4, %v2477_v0  ;;  %v584_v9 = vsel %vm360_vm7, %v583_v3, %v2478_v39  ;;  %v2458_v3 = vunpack.i.h.bf16 %v2456_v62 }
 0x153   : > { %v2491_v2 = vpop.permute.xlu0 %2490  ;;  %v578_v25 = vsel %vm362_vm8, %v577_v54, %v2447_v58  ;;  %v585_v19 = vsel %vm362_vm8, %v584_v9, %v2448_v48  ;;  %v2462_v48 = vunpack.i.l.bf16 %v3503_v21  ;;  %v1519_v54 = vrot.slane %v3106_v63, 4 }
 0x154   : > { %v2493_v17 = vunpack.i.h.bf16 %v2491_v2  ;;  %v2492_v33 = vunpack.i.l.bf16 %v2491_v2  ;;  %v2497_v2 = vunpack.i.l.bf16 %v2496_v24  ;;  %v1461_v9 = vrot.slane %v3086_v56, 4 }
 0x155   : > { %v2486_v22 = vpop.permute.xlu1 %2485 }
 0x156   : > { %v2488_v15 = vunpack.i.h.bf16 %v2486_v22  ;;  %v2487_v23 = vunpack.i.l.bf16 %v2486_v22  ;;  %v2463_v22 = vunpack.i.h.bf16 %v3503_v21  ;;  %v2051_v21 = vrot.slane %v3371_v18, 4 }
 0x157   : > { %v3525_v49 = vpop.permute.xlu2 %2530 }
 0x158   : > { %v786_v12 = vsel %vm352_vm3, %v3343_v11, %v2488_v15  ;;  %v779_v46 = vsel %vm352_vm3, %v3339_v5, %v2487_v23  ;;  %v579_v11 = vsel %vm364_vm9, %v578_v25, %v2482_v43  ;;  %v586_v5 = vsel %vm364_vm9, %v585_v19, %v2483_v26 }
 0x159   : > { %v787_v16 = vsel %vm354_vm4, %v786_v12, %v2453_v45  ;;  %v780_v20 = vsel %vm354_vm4, %v779_v46, %v2452_v52  ;;  %v2045_v42 = vrot.slane %v579_v11, 4  ;;  %v2046_v36 = vrot.slane %v586_v5, 4 }
 0x15a   : > { %v788_v40 = vsel %vm356_vm5, %v787_v16, %v2493_v17  ;;  %v781_v38 = vsel %vm356_vm5, %v780_v20, %v2492_v33  ;;  %v2457_v45 = vunpack.i.l.bf16 %v2456_v62  ;;  %v2498_v52 = vunpack.i.h.bf16 %v2496_v24 }
 0x15b   : > { %v3529_v29 = vsel %vm2067_vm10, %v3178_v59, %v2045_v42  ;;  %v3533_v4 = vsel %vm2067_vm10, %v3181_v37, %v2046_v36  ;;  %v789_v15 = vsel %vm358_vm6, %v788_v40, %v2458_v3  ;;  %v2052_v17 = vrot.slane %v3374_v32, 4 }
 0x15c   : > { %4284 = vst [vmem:[#allocation5_spill] sm:$0xff] %v3529_v29  ;;  %v782_v58 = vsel %vm358_vm6, %v781_v38, %v2457_v45  ;;  %v790_v37 = vsel %vm360_vm7, %v789_v15, %v2498_v52  ;;  %v1517_v20 = vrot.slane %v3083_v55, 4  ;;  %v1463_v32 = vrot.slane %v3109_v1, 4 }
 0x15d   : > { %v2501_v57 = vpop.permute.xlu1 %2500  ;;  %4285 = vst [vmem:[#allocation6_spill] sm:$0xff] %v3533_v4  ;;  %v783_v43 = vsel %vm360_vm7, %v782_v58, %v2497_v2  ;;  %v791_v24 = vsel %vm362_vm8, %v790_v37, %v2463_v22  ;;  %v1520_v25 = vsel %vm184_vm0, %v3083_v55, %v1519_v54  ;;  %v1462_v19 = vsel %vm184_vm0, %v1461_v9, %v3109_v1 }
 0x15e   : > { %v2503_v23 = vunpack.i.h.bf16 %v2501_v57  ;;  %v2502_v26 = vunpack.i.l.bf16 %v2501_v57  ;;  %v784_v62 = vsel %vm362_vm8, %v783_v43, %v2462_v48  ;;  %v1518_v18 = vsel %vm184_vm0, %v1517_v20, %v3106_v63 }
 0x15f   : > { %v3543_v39 = vpop.permute.xlu2 %1845  ;;  %v1505_v36 = vrot.slane %v3115_v28, 4  ;;  %v1449_v57 = vrot.slane %v3112_v6, 4  ;;  %v2508_v3 = vunpack.i.h.bf16 %v3509_v30  ;;  %v2507_v63 = vunpack.i.l.bf16 %v3509_v30 }
 0x160   : > { %v785_v33 = vsel %vm364_vm9, %v784_v62, %v2502_v26  ;;  %v792_v12 = vsel %vm364_vm9, %v791_v24, %v2503_v23  ;;  %v1464_v2 = vsel %vm184_vm0, %v3086_v56, %v1463_v32  ;;  %v4281_v22 = vunpack.i.l.bf16 %v3446_v13 }
 0x161   : > { %v3554_v46 = vsel %vm2067_vm10, %v785_v33, %v2051_v21  ;;  %v3557_v16 = vsel %vm2067_vm10, %v792_v12, %v2052_v17  ;;  %v2433_v15 = vunpack.i.h.bf16 %v3495_v8  ;;  %v2432_v30 = vunpack.i.l.bf16 %v3495_v8 }
 0x162   : > { %4286 = vst [vmem:[#allocation7_spill] sm:$0xff] %v3554_v46  ;;  %v1450_v56 = vsel %vm184_vm0, %v1449_v57, %v3454_v35  ;;  %v4280_v26 = vunpack.i.l.bf16 %v3461_v44  ;;  %v3596_v37 = vperm.slane %v1518_v18, %v2842_v10  ;;  %v3599_v62 = vperm.slane %v1462_v19, %v2842_v10 }
 0x163   : > { %v3539_v59 = vpop.permute.xlu0 %2515  ;;  %4287 = vst [vmem:[#allocation8_spill] sm:$0xff] %v3557_v16  ;;  %v3603_v24 = vperm.slane %v3470_v60, %v2842_v10  ;;  %v3606_v21 = vperm.slane %v1520_v25, %v2842_v10  ;;  %v3609_v17 = vperm.slane %v1464_v2, %v2842_v10  ;;  %v3613_v33 = vrot.slane %v4281_v22, 4 }
 0x164   : > { %v1929_v12 = vrot.slane %v3485_v50, 4  ;;  %v3620_v9 = vperm.slane %v1450_v56, %v2842_v10  ;;  %v3624_v60 = vrot.slane %v2433_v15, 4  ;;  %v1873_v18 = vrot.slane %v3438_v53, 4 }
 0x165   : > { %v3547_v0 = vpop.permute.xlu1 %2510  ;;  %v3633_v32 = vperm.slane %v3473_v61, %v2842_v10  ;;  %v3641_v25 = vrot.slane %v4280_v26, 4  ;;  %v3645_v19 = vperm.slane %v3480_v41, %v2842_v10  ;;  %v2533_v57 = vunpack.i.h.bf16 %v3525_v49 }
 0x167   : > { %v3569_v42 = vpop.permute.xlu2 %2545 }
 0x168   : > { %v2548_v41 = vunpack.i.h.bf16 %v3569_v42 }
 0x16b   : > { %v2526_v40 = vpop.permute.xlu0 %2525 }
 0x16c   : > { %v2528_v45 = vunpack.i.h.bf16 %v2526_v40  ;;  %v2527_v52 = vunpack.i.l.bf16 %v2526_v40  ;;  %v3628_v40 = vrot.slane %v2432_v30, 4 }
 0x16d   : > { %v2521_v38 = vpop.permute.xlu1 %2520 }
 0x16e   : > { %v2523_v11 = vunpack.i.h.bf16 %v2521_v38  ;;  %v2522_v5 = vunpack.i.l.bf16 %v2521_v38  ;;  %v3637_v38 = vperm.slane %v3476_v34, %v2842_v10  ;;  %v2532_v34 = vunpack.i.l.bf16 %v3525_v49 }
 0x16f   : > { %v1840_v61 = vpop.permute.xlu2 %1839 }
 0x170   : > { %v1207_v55 = vsel %vm352_vm3, %v3419_v47, %v2523_v11  ;;  %v1200_v1 = vsel %vm352_vm3, %v3416_v27, %v2522_v5  ;;  %v1506_v27 = vsel %vm184_vm0, %v1505_v36, %v3457_v14  ;;  %v2513_v5 = vunpack.i.h.bf16 %v3547_v0 }
 0x171   : > { %v1201_v48 = vsel %vm354_vm4, %v1200_v1, %v2507_v63  ;;  %v1208_v58 = vsel %vm354_vm4, %v1207_v55, %v2508_v3  ;;  %v3617_v54 = vperm.slane %v1506_v27, %v2842_v10  ;;  %v2512_v36 = vunpack.i.l.bf16 %v3547_v0 }
 0x172   : > { %v1202_v23 = vsel %vm356_vm5, %v1201_v48, %v2527_v52  ;;  %v1209_v47 = vsel %vm356_vm5, %v1208_v58, %v2528_v45  ;;  %v2518_v3 = vunpack.i.h.bf16 %v3539_v59  ;;  %v2547_v63 = vunpack.i.l.bf16 %v3569_v42 }
 0x173   : > { %v3593_v43 = vpop.permute.xlu0 %1841  ;;  %v2517_v45 = vunpack.i.l.bf16 %v3539_v59  ;;  %v1203_v52 = vsel %vm358_vm6, %v1202_v23, %v2512_v36  ;;  %v1210_v55 = vsel %vm358_vm6, %v1209_v47, %v2513_v5  ;;  %v1919_v2 = vrot.slane %v1840_v61, 4 }
 0x174   : > { %v1204_v48 = vsel %vm360_vm7, %v1203_v52, %v2532_v34  ;;  %v1211_v58 = vsel %vm360_vm7, %v1210_v55, %v2533_v57  ;;  %v3664_v59 = vperm.slane %v3483_v7, %v2842_v10  ;;  %v1294_v47 = vrot.slane %v2547_v63, 4 }
 0x175   : > { %v2536_v20 = vpop.permute.xlu1 %2535  ;;  %v1205_v56 = vsel %vm362_vm8, %v1204_v48, %v2517_v45  ;;  %v1212_v26 = vsel %vm362_vm8, %v1211_v58, %v2518_v3  ;;  %v3670_v36 = vperm.slane %v3489_v51, %v2842_v10  ;;  %v1473_v51 = vrot.slane %v3599_v62, 4 }
 0x176   : > { %v2537_v1 = vunpack.i.l.bf16 %v2536_v20  ;;  %v2538_v49 = vunpack.i.h.bf16 %v2536_v20  ;;  %v1296_v20 = vrot.slane %v2548_v41, 4  ;;  %v1529_v48 = vrot.slane %v3596_v37, 4 }
 0x178   : > { %v3679_v52 = vsel %vm364_vm9, %v1205_v56, %v2537_v1 }
 0x17b   : > { %v1848_v0 = vpop.permute.xlu0 %1847 }
 0x17c   : > { %v1917_v27 = vrot.slane %v1848_v0, 4  ;;  %v1920_v45 = vsel %vm184_vm0, %v1848_v0, %v1919_v2  ;;  %v1295_v2 = vsel %vm184_vm0, %v1294_v47, %v2548_v41 }
 0x17d   : > { %v1844_v5 = vpop.permute.xlu1 %1843  ;;  %v3706_v56 = vperm.slane %v1920_v45, %v2842_v10 }
 0x17e   : > { %v1930_v57 = vsel %vm184_vm0, %v1929_v12, %v1844_v5  ;;  %v1931_v34 = vrot.slane %v1844_v5, 4  ;;  %v1918_v3 = vsel %vm184_vm0, %v1917_v27, %v1840_v61  ;;  %v3686_v12 = vsel %vm364_vm9, %v1212_v26, %v2538_v49 }
 0x17f   : > { %v3676_v7 = vperm.slane %v1930_v57, %v2842_v10  ;;  %v1474_v27 = vsel %vm184_vm0, %v1473_v51, %v3620_v9  ;;  %v1530_v26 = vsel %vm184_vm0, %v1529_v48, %v3617_v54  ;;  %v3703_v41 = vperm.slane %v1918_v3, %v2842_v10 }
 0x180   : > { %v1932_v55 = vsel %vm184_vm0, %v3485_v50, %v1931_v34  ;;  %v1874_v50 = vsel %vm184_vm0, %v1873_v18, %v3593_v43  ;;  %v1297_v57 = vsel %vm184_vm0, %v2547_v63, %v1296_v20  ;;  %v3711_v18 = vperm.slane %v1295_v2, %v2842_v10 }
 0x181   : > { %v3691_v0 = vperm.slane %v1932_v55, %v2842_v10  ;;  %v1941_v1 = vrot.slane %v3676_v7, 4  ;;  %v3714_v51 = vperm.slane %v1874_v50, %v2842_v10  ;;  %v3719_v45 = vperm.slane %v1474_v27, %v2873_v31 }
 0x182   : > { %v3730_v50 = vperm.slane %v1530_v26, %v2873_v31  ;;  %v1861_v61 = vrot.slane %v3543_v39, 4 }
 0x183   : > { %v1953_v47 = vrot.slane %v3691_v0, 4  ;;  %v2551_v5 = vpop.permute.xlu0 %2550  ;;  %v1942_v3 = vsel %vm184_vm0, %v1941_v1, %v3703_v41  ;;  %v1885_v23 = vrot.slane %v3714_v51, 4  ;;  %v1497_v11 = vrot.slane %v3719_v45, 4 }
 0x184   : > { %v2553_v34 = vunpack.i.h.bf16 %v2551_v5  ;;  %v2552_v55 = vunpack.i.l.bf16 %v2551_v5  ;;  %v3741_v26 = vperm.slane %v1942_v3, %v2873_v31  ;;  %v1553_v22 = vrot.slane %v3730_v50, 4 }
 0x185   : > { %v2541_v48 = vpop.permute.xlu1 %2540  ;;  %v3723_v49 = vsel %vm184_vm0, %v1953_v47, %v3706_v56  ;;  %v3736_v47 = vperm.slane %v1297_v57, %v2842_v10 }
 0x186   : > { %v1712_v63 = vsel %vm184_vm0, %v3624_v60, %v2553_v34  ;;  %v1713_v20 = vrot.slane %v2553_v34, 4  ;;  %v1656_v2 = vsel %vm184_vm0, %v3628_v40, %v2552_v55  ;;  %v2543_v27 = vunpack.i.h.bf16 %v2541_v48 }
 0x187   : > { %v1718_v5 = vperm.slane %v1712_v63, %v2842_v10  ;;  %v1662_v1 = vperm.slane %v1656_v2, %v2842_v10  ;;  %v2542_v58 = vunpack.i.l.bf16 %v2541_v48  ;;  %v1657_v34 = vrot.slane %v2552_v55, 4 }
 0x188   : > { %v1714_v48 = vsel %vm184_vm0, %v2433_v15, %v1713_v20  ;;  %v1238_v2 = vrot.slane %v2543_v27, 4  ;;  %v4288_v63 = vunpack.i.l.bf16 %v3446_v13 }
 0x189   : > { %v1737_v40 = vrot.slane %v1718_v5, 4  ;;  %v1681_v42 = vrot.slane %v1662_v1, 4  ;;  %v1307_v57 = vsel %vm184_vm0, %v3641_v25, %v2542_v58  ;;  %v1658_v3 = vsel %vm184_vm0, %v2432_v30, %v1657_v34 }
 0x18a   : > { %v1313_v55 = vperm.slane %v1307_v57, %v2842_v10  ;;  %v1239_v15 = vsel %vm184_vm0, %v1238_v2, %v4288_v63  ;;  %v3764_v57 = vperm.slane %v1714_v48, %v2842_v10  ;;  %v1308_v4 = vrot.slane %v2542_v58, 4 }
 0x18b   : > { %v1682_v20 = vsel %vm184_vm0, %v3603_v24, %v1681_v42  ;;  %v1738_v25 = vsel %vm184_vm0, %v3633_v32, %v1737_v40  ;;  %v1245_v60 = vperm.slane %v1239_v15, %v2842_v10  ;;  %v3775_v40 = vperm.slane %v1658_v3, %v2842_v10 }
 0x18c   : > { %v1318_v30 = vrot.slane %v1313_v55, 4  ;;  %v1690_v34 = vperm.slane %v1682_v20, %v2873_v31  ;;  %v1746_v42 = vperm.slane %v1738_v25, %v2873_v31  ;;  %v4289_v48 = vrot.slane %v3603_v24, 4 }
 0x18d   : > { %v3767_v29 = vpop.permute.xlu1 %1837  ;;  %v3782_v2 = vsel %vm184_vm0, 0.0, %v1497_v11  ;;  %v1241_v15 = vsel %vm184_vm0, %v2543_v27, %v3613_v33  ;;  %v4290_v25 = vrot.slane %v3633_v32, 4  ;;  %v4291_v24 = vunpack.i.l.bf16 %v3461_v44 }
 0x18e   : > { %v1862_v13 = vsel %vm184_vm0, %v1861_v61, %v3767_v29  ;;  %v1680_v58 = vsel %vm184_vm0, %v4289_v48, %v1662_v1  ;;  %v2559_v61 = vpack.i.bf16 %v1746_v42, %v1690_v34  ;;  %v4292_v32 = vrot.slane %v3637_v38, 4 }
 0x18f   : > { %v1868_v63 = vperm.slane %v1862_v13, %v2842_v10  ;;  %v3787_v20 = vperm.slane %v1680_v58, %v2873_v31  ;;  %v1736_v3 = vsel %vm184_vm0, %v4290_v25, %v1718_v5  ;;  %v1309_v1 = vsel %vm184_vm0, %v4291_v24, %v1308_v4 }
 0x190   : > { %v3797_v11 = vperm.slane %v1736_v3, %v2873_v31  ;;  %2560 = vrot.lane.b32.xlu1 %v2559_v61, %s2736_s4  ;;  %v1263_v5 = vsel %vm184_vm0, %v4292_v32, %v1245_v60  ;;  %v1319_v44 = vsel %vm184_vm0, %v1318_v30, %v3711_v18  ;;  %v3819_v25 = vperm.slane %v1309_v1, %v2842_v10 }
 0x191   : > { %v1886_v48 = vsel %vm184_vm0, %v1885_v23, %v1868_v63  ;;  %v1703_v33 = vrot.slane %v3787_v20, 4  ;;  %v3813_v23 = vperm.slane %v1263_v5, %v2873_v31  ;;  %v3816_v61 = vperm.slane %v1319_v44, %v2873_v31 }
 0x192   : > { %v3803_v27 = vperm.slane %v1886_v48, %v2873_v31  ;;  %v1759_v58 = vrot.slane %v3797_v11, 4  ;;  %v1554_v48 = vsel %vm184_vm0, 0.0, %v1553_v22  ;;  %v1264_v30 = vrot.slane %v1245_v60, 4 }
 0x193   : > { %v1704_v3 = vsel %vm184_vm0, 0.0, %v1703_v33  ;;  %v1286_v13 = vrot.slane %v3813_v23, 4  ;;  %v1342_v5 = vrot.slane %v3816_v61, 4  ;;  %v1887_v4 = vrot.slane %v1868_v63, 4 }
 0x194   : > { %v1909_v24 = vrot.slane %v3803_v27, 4  ;;  %v1760_v32 = vsel %vm184_vm0, 0.0, %v1759_v58  ;;  %v1705_v16 = vrot.slane %v1690_v34, 4  ;;  %v2569_v22 = vpack.i.bf16 %v1554_v48, %v3782_v2 }
 0x195   : > { %v2554_v8 = vpack.i.bf16 %v1760_v32, %v1704_v3  ;;  %v1287_v1 = vsel %vm184_vm0, 0.0, %v1286_v13  ;;  %v1343_v33 = vsel %vm184_vm0, 0.0, %v1342_v5  ;;  %v1761_v60 = vrot.slane %v1746_v42, 4 }
 0x196   : > { %v1910_v44 = vsel %vm184_vm0, 0.0, %v1909_v24  ;;  %v2564_v58 = vpack.i.bf16 %v1343_v33, %v1287_v1  ;;  %v3834_v46 = vsel %vm184_vm0, 0.0, %v1705_v16  ;;  %v1475_v63 = vrot.slane %v3620_v9, 4 }
 0x197   : > { %1974 = vrot.lane.b32.xlu2 %v1910_v44, %s2738_s6  ;;  %2555 = vrot.lane.b32.xlu0 %v2554_v8, %s2738_s6  ;;  %v1531_v3 = vrot.slane %v3617_v54, 4  ;;  %v3839_v34 = vsel %vm184_vm0, 0.0, %v1761_v60  ;;  %v1265_v13 = vsel %vm184_vm0, %v3637_v38, %v1264_v30  ;;  %v4293_v24 = vrot.slane %v3711_v18, 4 }
 0x198   : > { %v4294_v8 = vrot.slane %v3645_v19, 4  ;;  %2565 = vrot.lane.b32.xlu1 %v2564_v58, %s2738_s6  ;;  %v2574_v54 = vpack.i.bf16 %v3839_v34, %v3834_v46  ;;  %v1476_v9 = vsel %vm184_vm0, %v3599_v62, %v1475_v63  ;;  %v3858_v18 = vperm.slane %v1265_v13, %v2873_v31 }
 0x199   : > { %v1321_v42 = vsel %vm184_vm0, %v1313_v55, %v4293_v24  ;;  %v1532_v38 = vsel %vm184_vm0, %v3596_v37, %v1531_v3  ;;  %v3861_v55 = vperm.slane %v1476_v9, %v2873_v31  ;;  %v3873_v62 = vperm.slane %v1241_v15, %v2842_v10 }
 0x19a   : > { %v1692_v16 = vsel %vm184_vm0, %v4294_v8, %v3775_v40  ;;  %v3864_v2 = vperm.slane %v1532_v38, %v2873_v31  ;;  %v3867_v48 = vperm.slane %v1321_v42, %v2873_v31  ;;  %v1888_v37 = vsel %vm184_vm0, %v3714_v51, %v1887_v4 }
 0x19b   : > { %v3870_v46 = vperm.slane %v1692_v16, %v2873_v31  ;;  %v4295_v30 = vrot.slane %v3664_v59, 4  ;;  %v1288_v5 = vrot.slane %v3858_v18, 4  ;;  %v1330_v51 = vrot.slane %v3819_v25, 4 }
 0x19c   : > { %v2584_v44 = vpack.i.bf16 %v3864_v2, %v3861_v55  ;;  %v2579_v1 = vpack.i.bf16 %v3867_v48, %v3858_v18  ;;  %v1344_v15 = vrot.slane %v3867_v48, 4  ;;  %v4296_v4 = vrot.slane %v3741_v26, 4 }
 0x19d   : > { %v1748_v32 = vsel %vm184_vm0, %v4295_v30, %v3764_v57  ;;  %v3895_v58 = vsel %vm184_vm0, 0.0, %v1288_v5  ;;  %v1707_v63 = vrot.slane %v3870_v46, 4  ;;  %v1499_v24 = vrot.slane %v3861_v55, 4 }
 0x19e   : > { %v3887_v33 = vperm.slane %v1748_v32, %v2873_v31  ;;  %v1966_v60 = vsel %vm184_vm0, 0.0, %v4296_v4  ;;  %v3902_v34 = vsel %vm184_vm0, 0.0, %v1344_v15  ;;  %v3908_v42 = vperm.slane %v1888_v37, %v2873_v31 }
 0x19f   : > { %2570 = vrot.lane.b32.xlu2 %v2569_v22, %s2738_s6  ;;  %2002 = vrot.lane.b32.xlu0 %v1966_v60, %s2738_s6  ;;  %v2594_v8 = vpack.i.bf16 %v3902_v34, %v3895_v58  ;;  %v3913_v22 = vsel %vm184_vm0, 0.0, %v1707_v63  ;;  %v1555_v16 = vrot.slane %v3864_v2, 4  ;;  %v4297_v9 = vrot.slane %v3703_v41, 4  ;;  %s2136_s6 = scalar_lea.sflag [#allocation3], %s161_s24 }
 0x1a0   : > { %v2589_v3 = vpack.i.bf16 %v3887_v33, %v3870_v46  ;;  %v1763_v13 = vrot.slane %v3887_v33, 4  ;;  %v3924_v30 = vsel %vm184_vm0, 0.0, %v1499_v24  ;;  %v4298_v37 = vrot.slane %v3670_v36, 4  ;;  %1978 = vrot.lane.b32.xlu1 %v3908_v42, %s2736_s4 }
 0x1a1   : > { %v1944_v38 = vsel %vm184_vm0, %v3676_v7, %v4297_v9  ;;  %v3935_v2 = vsel %vm184_vm0, 0.0, %v1555_v16  ;;  %v1331_v5 = vsel %vm184_vm0, %v1330_v51, %v3736_v47  ;;  %v1507_v15 = vrot.slane %v3457_v14, 4 }
 0x1a2   : > { %v3921_v55 = vsel %vm184_vm0, 0.0, %v1763_v13  ;;  %v1275_v32 = vsel %vm184_vm0, %v4298_v37, %v3873_v62  ;;  %v1451_v4 = vrot.slane %v3454_v35, 4  ;;  %v2599_v60 = vpack.i.bf16 %v3935_v2, %v3924_v30 }
 0x1a3   : > { %v2604_v41 = vpack.i.bf16 %v3921_v55, %v3913_v22  ;;  %v3938_v7 = vperm.slane %v1275_v32, %v2873_v31  ;;  %v3947_v63 = vperm.slane %v1331_v5, %v2873_v31  ;;  %v4299_v13 = vrot.slane %v3775_v40, 4 }
 0x1a4   : > { %v4300_v16 = vrot.slane %v3764_v57, 4  ;;  %v4301_v35 = vrot.slane %v3706_v56, 4  ;;  %v1952_v37 = vperm.slane %v1944_v38, %v2873_v31  ;;  %v1332_v32 = vrot.slane %v3736_v47, 4 }
 0x1a5   : > { %v1694_v24 = vsel %vm184_vm0, %v3645_v19, %v4299_v13  ;;  %v1290_v14 = vrot.slane %v3938_v7, 4  ;;  %v1276_v56 = vrot.slane %v3873_v62, 4  ;;  %v1485_v5 = vrot.slane %v3609_v17, 4 }
 0x1a6   : > { %v1750_v51 = vsel %vm184_vm0, %v3664_v59, %v4300_v16  ;;  %v3962_v9 = vsel %vm184_vm0, %v3691_v0, %v4301_v35  ;;  %v3968_v19 = vperm.slane %v1694_v24, %v2873_v31  ;;  %v1541_v59 = vrot.slane %v3606_v21, 4 }
 0x1a7   : > { %v3971_v57 = vperm.slane %v1750_v51, %v2873_v31  ;;  %v1346_v0 = vrot.slane %v3947_v63, 4  ;;  %2006 = vrot.lane.b32.xlu2 %v1952_v37, %s2736_s4  ;;  %2575 = vrot.lane.b32.xlu0 %v2574_v54, %s2737_s5  ;;  %v1452_v47 = vsel %vm184_vm0, %v3112_v6, %v1451_v4  ;;  %v1508_v62 = vsel %vm184_vm0, %v3115_v28, %v1507_v15 }
 0x1a8   : > { %v1709_v13 = vrot.slane %v3968_v19, 4  ;;  %v3989_v16 = vsel %vm184_vm0, 0.0, %v1290_v14  ;;  %v1460_v35 = vperm.slane %v1452_v47, %v2842_v10  ;;  %v1516_v38 = vperm.slane %v1508_v62, %v2842_v10  ;;  %2585 = vrot.lane.b32.xlu1 %v2584_v44, %s2736_s4 }
 0x1a9   : > { %v1765_v24 = vrot.slane %v3971_v57, 4  ;;  %v3992_v51 = vsel %vm184_vm0, 0.0, %v1346_v0  ;;  %v1277_v28 = vsel %vm184_vm0, %v3670_v36, %v1276_v56  ;;  %v1333_v15 = vsel %vm184_vm0, %v3819_v25, %v1332_v32 }
 0x1aa   : > { %v2624_v40 = vpack.i.bf16 %v3992_v51, %v3989_v16  ;;  %v3999_v54 = vsel %vm184_vm0, 0.0, %v1709_v13  ;;  %v1486_v4 = vsel %vm184_vm0, %v1485_v5, %v1460_v35  ;;  %v1542_v14 = vsel %vm184_vm0, %v1541_v59, %v1516_v38 }
 0x1ab   : > { %v4003_v6 = vsel %vm184_vm0, 0.0, %v1765_v24  ;;  %v4014_v13 = vperm.slane %v1277_v28, %v2873_v31  ;;  %v1492_v44 = vperm.slane %v1486_v4, %v2873_v31  ;;  %v1548_v24 = vperm.slane %v1542_v14, %v2873_v31 }
 0x1ac   : > { %v2634_v0 = vpack.i.bf16 %v4003_v6, %v3999_v54  ;;  %v4019_v47 = vperm.slane %v1333_v15, %v2873_v31  ;;  %v1875_v36 = vrot.slane %v3593_v43, 4  ;;  %v1967_v25 = vrot.slane %v1952_v37, 4 }
 0x1ad   : > { %v1292_v32 = vrot.slane %v4014_v13, 4  ;;  %v2614_v56 = vpack.i.bf16 %v1548_v24, %v1492_v44  ;;  %v1863_v62 = vrot.slane %v3767_v29, 4  ;;  %v1501_v43 = vrot.slane %v1492_v44, 4 }
 0x1ae   : > { %v2639_v59 = vpack.i.bf16 %v4019_v47, %v4014_v13  ;;  %v1348_v5 = vrot.slane %v4019_v47, 4  ;;  %v1557_v37 = vrot.slane %v1548_v24, 4  ;;  %v1876_v29 = vsel %vm184_vm0, %v3438_v53, %v1875_v36 }
 0x1af   : > { %2590 = vrot.lane.b32.xlu2 %v2589_v3, %s2735_s30  ;;  %v4032_v28 = vsel %vm184_vm0, 0.0, %v1292_v32  ;;  %2580 = vrot.lane.b32.xlu0 %v2579_v1, %s2736_s4  ;;  %v1968_v4 = vsel %vm184_vm0, 0.0, %v1967_v25  ;;  %v1502_v33 = vsel %vm184_vm0, 0.0, %v1501_v43  ;;  %v1864_v18 = vsel %vm184_vm0, %v3543_v39, %v1863_v62 }
 0x1b0   : > { %v1349_v15 = vsel %vm184_vm0, 0.0, %v1348_v5  ;;  %2010 = vrot.lane.b32.xlu1 %v1968_v4, %s2737_s5  ;;  %v1558_v3 = vsel %vm184_vm0, 0.0, %v1557_v37  ;;  %v1911_v48 = vrot.slane %v3908_v42, 4  ;;  %v1884_v14 = vperm.slane %v1876_v29, %v2842_v10 }
 0x1b1   : > { %v2649_v46 = vpack.i.bf16 %v1349_v15, %v4032_v28  ;;  %v2629_v1 = vpack.i.bf16 %v1558_v3, %v1502_v33  ;;  %v1872_v53 = vperm.slane %v1864_v18, %v2842_v10  ;;  %v4302_v10 = vpack.i.bf16 %v3947_v63, %v3938_v7 }
 0x1b2   : > { %v1912_v13 = vsel %vm184_vm0, 0.0, %v1911_v48  ;;  %v1897_v44 = vrot.slane %v1884_v14, 4  ;;  %v1487_v58 = vrot.slane %v1460_v35, 4  ;;  %v1543_v34 = vrot.slane %v1516_v38, 4 }
 0x1b3   : > { %v1960_v30 = vperm.slane %v3723_v49, %v2873_v31  ;;  %v4303_v49 = vpack.i.bf16 %v3971_v57, %v3968_v19  ;;  %v1899_v36 = vrot.slane %v1872_v53, 4  ;;  %v1964_v32 = vperm.slane %v3962_v9, %v2873_v31 }
 0x1b4   : > { %v1898_v39 = vsel %vm184_vm0, %v1897_v44, %v1872_v53  ;;  %v1544_v22 = vsel %vm184_vm0, %v3606_v21, %v1543_v34 }
 0x1b5   : > { %v1904_v42 = vperm.slane %v1898_v39, %v2873_v31  ;;  %v1552_v24 = vperm.slane %v1544_v22, %v2873_v31  ;;  %v1969_v21 = vrot.slane %v1960_v30, 4  ;;  %v1900_v25 = vsel %vm184_vm0, %v1884_v14, %v1899_v36 }
 0x1b6   : > { %v1908_v19 = vperm.slane %v1900_v25, %v2873_v31  ;;  %v1971_v6 = vrot.slane %v1964_v32, 4 }
 0x1b7   : > { %2595 = vrot.lane.b32.xlu2 %v2594_v8, %s2737_s5  ;;  %1982 = vrot.lane.b32.xlu0 %v1912_v13, %s2737_s5  ;;  %v1488_v8 = vsel %vm184_vm0, %v3609_v17, %v1487_v58  ;;  %v1913_v55 = vrot.slane %v1904_v42, 4  ;;  %v1970_v47 = vsel %vm184_vm0, 0.0, %v1969_v21 }
 0x1b8   : > { %2605 = vrot.lane.b32.xlu1 %v2604_v41, %s2741_s9  ;;  %v1496_v41 = vperm.slane %v1488_v8, %v2873_v31  ;;  %v1915_v57 = vrot.slane %v1908_v19, 4  ;;  %v1972_v16 = vsel %vm184_vm0, 0.0, %v1971_v6 }
 0x1b9   : > { %v1914_v17 = vsel %vm184_vm0, 0.0, %v1913_v55 }
 0x1ba   : > { %v2644_v2 = vpack.i.bf16 %v1552_v24, %v1496_v41  ;;  %v1503_v7 = vrot.slane %v1496_v41, 4  ;;  %v1916_v54 = vsel %vm184_vm0, 0.0, %v1915_v57 }
 0x1bc   : > { %v1504_v63 = vsel %vm184_vm0, 0.0, %v1503_v7 }
 0x1bf   : > { %1986 = vrot.lane.b32.xlu2 %v1904_v42, %s2735_s30  ;;  %2600 = vrot.lane.b32.xlu0 %v2599_v60, %s2737_s5  ;;  %v1559_v60 = vrot.slane %v1552_v24, 4  ;;  %s2151_s5 = sshll.u32 %s2147_s29, 4  ;;  %s2152_s5 = int_to_ptr.hbm [resolvable:$true] %s2151_s5 }
 0x1c0   : > { %2610 = vrot.lane.b32.xlu1 %v4302_v10, %s2735_s30  ;;  %s2682_s16 = sshra.s32 %s2152_s5, 4  ;;  %s2683_s16 = int_to_ptr.hbm [resolvable:$true] %s2682_s16 }
 0x1c1   : > { %v1560_v38 = vsel %vm184_vm0, 0.0, %v1559_v60  ;;  %p2689_p0 = scmp.lt.s32.totalorder %s2683_s16, %s4279_s3 }
 0x1c2   : > { %v2654_v35 = vpack.i.bf16 %v1560_v38, %v1504_v63 }
 0x1c7   : > { %2615 = vrot.lane.b32.xlu2 %v2614_v56, %s2735_s30  ;;  %2014 = vrot.lane.b32.xlu0 %v1960_v30, %s2735_s30  ;;  %s163_s30 = scalar_lea.vmem [#allocation2], %s2215_s25 }
 0x1c8   : > { %1990 = vrot.lane.b32.xlu1 %v1914_v17, %s2741_s9  ;;  %s2149_s4 = sshll.u32 %s163_s30, 4  ;;  %s2150_s4 = int_to_ptr.vmem [resolvable:$true] %s2149_s4 }
 0x1cf   : > { %2018 = vrot.lane.b32.xlu2 %v1970_v47, %s2741_s9  ;;  %2620 = vrot.lane.b32.xlu0 %v4303_v49, %s2739_s7 }
 0x1d0   : > { %2630 = vrot.lane.b32.xlu1 %v2629_v1, %s2741_s9 }
 0x1d7   : > { %2635 = vrot.lane.b32.xlu2 %v2634_v0, %s2740_s8  ;;  %2625 = vrot.lane.b32.xlu0 %v2624_v40, %s2741_s9 }
 0x1d8   : > { %2022 = vrot.lane.b32.xlu1 %v1964_v32, %s2739_s7 }
 0x1df   : > { %2640 = vrot.lane.b32.xlu2 %v2639_v59, %s2739_s7  ;;  %1994 = vrot.lane.b32.xlu0 %v1908_v19, %s2739_s7 }
 0x1e0   : > { %1998 = vrot.lane.b32.xlu1 %v1916_v54, %s2740_s8 }
 0x1e7   : > { %2026 = vrot.lane.b32.xlu2 %v1972_v16, %s2740_s8  ;;  %2645 = vrot.lane.b32.xlu0 %v2644_v2, %s2739_s7  ;;  %s2684_s7 = scalar_lea.hbm %s2683_s16, 16 }
 0x1e8   : > { %2655 = vrot.lane.b32.xlu1 %v2654_v35, %s2740_s8  ;;  %p2685_p11 = scmp.ne.s32.totalorder %s2683_s16, %s2684_s7  ;;  %p2690_p1 = scmp.lt.s32.totalorder %s2688_s10, %s2684_s7 }
 0x1ea   : > { %p2686_p12 = pnand %p2685_p11, %p2802_p5  ;;  %p2691_p2 = por %p2690_p1, %p2689_p0 }
 0x1ec   : > { %p2687_p13 = pneg %p2686_p12 }
 0x1ee   : > { %p2692_p3 = pnand %p2691_p2, %p2687_p13 }
 0x1ef   : > { %2650 = vrot.lane.b32.xlu0 %v2649_v46, %s2740_s8 }
 0x1f1   : > { %v4115_v31 = vpop.permute.xlu2 %1974 }
 0x1f9   : > { %v4117_v9 = vpop.permute.xlu2 %2570 }
 0x201   : > { %v2007_v40 = vpop.permute.xlu2 %2006 }
 0x202   : > { %v2561_v51 = vpop.permute.xlu1 %2560 }
 0x203   : > { %v2563_v62 = vunpack.i.h.bf16 %v2561_v51  ;;  %v2562_v28 = vunpack.i.l.bf16 %v2561_v51 }
 0x209   : > { %v2591_v0 = vpop.permute.xlu2 %2590  ;;  %v2556_v56 = vpop.permute.xlu0 %2555 }
 0x20a   : > { %v2558_v59 = vunpack.i.h.bf16 %v2556_v56  ;;  %v2557_v5 = vunpack.i.l.bf16 %v2556_v56  ;;  %v2566_v43 = vpop.permute.xlu1 %2565  ;;  %v2593_v53 = vunpack.i.h.bf16 %v2591_v0  ;;  %v2592_v13 = vunpack.i.l.bf16 %v2591_v0 }
 0x20b   : > { %v2568_v10 = vunpack.i.h.bf16 %v2566_v43  ;;  %v2567_v58 = vunpack.i.l.bf16 %v2566_v43  ;;  %v170_v43 = vld [vmem:[%s4278_s2] sm:$0xff] }
 0x20c   : > { %v1830_v37 = vsel %vm352_vm3, %v3797_v11, %v2558_v59  ;;  %v1823_v15 = vsel %vm352_vm3, %v3787_v20, %v2557_v5  ;;  %v2029_v5 = vsel %vm352_vm3, %v3803_v27, %v4115_v31  ;;  %v2573_v27 = vunpack.i.h.bf16 %v4117_v9 }
 0x20d   : > { %v1824_v29 = vsel %vm354_vm4, %v1823_v15, %v2562_v28  ;;  %v1831_v4 = vsel %vm354_vm4, %v1830_v37, %v2563_v62  ;;  %v1413_v55 = vsel %vm352_vm3, %v3816_v61, %v2568_v10  ;;  %v1406_v41 = vsel %vm352_vm3, %v3813_v23, %v2567_v58 }
 0x20e   : > { %v2743_v15 = vmov 0   ;;  %v2572_v31 = vunpack.i.l.bf16 %v4117_v9  ;;  %v1624_v9 = vsel %vm352_vm3, %v3730_v50, %v2573_v27 }
 0x20f   : > { %2659 = vset.pattern.permute.xlu2 %v2743_v15  ;;  %2660 = vset.pattern.permute.xlu0 %v2743_v15 }
 0x210   : > { %2078 = vperm.xlu2 %2659, %v170_v43  }
 0x211   : > { %v2596_v46 = vpop.permute.xlu2 %2595  ;;  %v2003_v33 = vpop.permute.xlu0 %2002 }
 0x212   : > { %v1979_v3 = vpop.permute.xlu1 %1978  ;;  %v2598_v24 = vunpack.i.h.bf16 %v2596_v46  ;;  %v2597_v30 = vunpack.i.l.bf16 %v2596_v46  ;;  %v2036_v57 = vsel %vm352_vm3, %v3741_v26, %v2003_v33 }
 0x213   : > { %v2037_v6 = vsel %vm354_vm4, %v2036_v57, %v2007_v40  ;;  %v2030_v28 = vsel %vm354_vm4, %v2029_v5, %v1979_v3 }
 0x219   : > { %v2576_v18 = vpop.permute.xlu0 %2575  ;;  %v1987_v14 = vpop.permute.xlu2 %1986 }
 0x21a   : > { %v2578_v48 = vunpack.i.h.bf16 %v2576_v18  ;;  %v2577_v1 = vunpack.i.l.bf16 %v2576_v18  ;;  %v4125_v44 = vpop.permute.xlu1 %2585 }
 0x21c   : > { %v1832_v11 = vsel %vm356_vm5, %v1831_v4, %v2578_v48  ;;  %v1825_v39 = vsel %vm356_vm5, %v1824_v29, %v2577_v1  ;;  %v2588_v29 = vunpack.i.h.bf16 %v4125_v44  ;;  %v2587_v4 = vunpack.i.l.bf16 %v4125_v44 }
 0x21d   : > { %v4130_v20 = vsel %vm358_vm6, %v1825_v39, %v2592_v13  ;;  %v4133_v42 = vsel %vm358_vm6, %v1832_v11, %v2593_v53  ;;  %v1617_v44 = vsel %vm352_vm3, %v3719_v45, %v2572_v31 }
 0x221   : > { %v2581_v34 = vpop.permute.xlu0 %2580  ;;  %v4141_v17 = vpop.permute.xlu2 %2615 }
 0x222   : > { %v2583_v8 = vunpack.i.h.bf16 %v2581_v34  ;;  %v2582_v22 = vunpack.i.l.bf16 %v2581_v34  ;;  %v2011_v2 = vpop.permute.xlu1 %2010  ;;  %v1618_v34 = vsel %vm354_vm4, %v1617_v44, %v2587_v4 }
 0x223   : > { %v2038_v16 = vsel %vm356_vm5, %v2037_v6, %v2011_v2 }
 0x224   : > { %v1407_v7 = vsel %vm354_vm4, %v1406_v41, %v2582_v22  ;;  %v1414_v60 = vsel %vm354_vm4, %v1413_v55, %v2583_v8  ;;  %v2618_v8 = vunpack.i.h.bf16 %v4141_v17  ;;  %v2617_v22 = vunpack.i.l.bf16 %v4141_v17 }
 0x225   : > { %v4144_v21 = vsel %vm356_vm5, %v1407_v7, %v2597_v30  ;;  %v4147_v63 = vsel %vm356_vm5, %v1414_v60, %v2598_v24 }
 0x229   : > { %v1983_v38 = vpop.permute.xlu0 %1982  ;;  %v2019_v35 = vpop.permute.xlu2 %2018 }
 0x22a   : > { %v2606_v61 = vpop.permute.xlu1 %2605  ;;  %v2031_v37 = vsel %vm356_vm5, %v2030_v28, %v1983_v38 }
 0x22b   : > { %v2608_v46 = vunpack.i.h.bf16 %v2606_v61  ;;  %v2032_v33 = vsel %vm358_vm6, %v2031_v37, %v1987_v14  ;;  %v2607_v18 = vunpack.i.l.bf16 %v2606_v61  ;;  %v1625_v14 = vsel %vm354_vm4, %v1624_v9, %v2588_v29  ;;  %v4307_v9 = vld [vmem:[#allocation6_spill] sm:$0xff] }
 0x22d   : > { %v1834_v55 = vsel %vm360_vm7, %v4133_v42, %v2608_v46  ;;  %v1827_v50 = vsel %vm360_vm7, %v4130_v20, %v2607_v18 }
 0x231   : > { %v2601_v47 = vpop.permute.xlu0 %2600  ;;  %v4151_v49 = vpop.permute.xlu2 %2635 }
 0x232   : > { %v4149_v23 = vpop.permute.xlu1 %2610  ;;  %v2603_v48 = vunpack.i.h.bf16 %v2601_v47  ;;  %v2602_v1 = vunpack.i.l.bf16 %v2601_v47  ;;  %v2638_v60 = vunpack.i.h.bf16 %v4151_v49  ;;  %v2637_v17 = vunpack.i.l.bf16 %v4151_v49 }
 0x234   : > { %v1619_v45 = vsel %vm356_vm5, %v1618_v34, %v2602_v1  ;;  %v1626_v41 = vsel %vm356_vm5, %v1625_v14, %v2603_v48 }
 0x235   : > { %v1620_v42 = vsel %vm358_vm6, %v1619_v45, %v2617_v22  ;;  %v1627_v20 = vsel %vm358_vm6, %v1626_v41, %v2618_v8 }
 0x239   : > { %v2015_v36 = vpop.permute.xlu0 %2014  ;;  %v4153_v19 = vpop.permute.xlu2 %2640 }
 0x23a   : > { %v1991_v25 = vpop.permute.xlu1 %1990  ;;  %v2039_v51 = vsel %vm358_vm6, %v2038_v16, %v2015_v36  ;;  %v2643_v31 = vunpack.i.h.bf16 %v4153_v19  ;;  %v2642_v29 = vunpack.i.l.bf16 %v4153_v19 }
 0x23b   : > { %v2040_v56 = vsel %vm360_vm7, %v2039_v51, %v2019_v35  ;;  %v2033_v53 = vsel %vm360_vm7, %v2032_v33, %v1991_v25  ;;  %v2613_v25 = vunpack.i.h.bf16 %v4149_v23 }
 0x23d   : > { %v1416_v43 = vsel %vm358_vm6, %v4147_v63, %v2613_v25 }
 0x241   : > { %v2621_v32 = vpop.permute.xlu0 %2620  ;;  %v2027_v62 = vpop.permute.xlu2 %2026 }
 0x242   : > { %v4157_v54 = vpop.permute.xlu1 %2630  ;;  %v2623_v13 = vunpack.i.h.bf16 %v2621_v32  ;;  %v2622_v11 = vunpack.i.l.bf16 %v2621_v32  ;;  %v2612_v32 = vunpack.i.l.bf16 %v4149_v23 }
 0x243   : > { %v2633_v2 = vunpack.i.h.bf16 %v4157_v54  ;;  %v2632_v7 = vunpack.i.l.bf16 %v4157_v54 }
 0x244   : > { %v1828_v24 = vsel %vm362_vm8, %v1827_v50, %v2622_v11  ;;  %v1835_v30 = vsel %vm362_vm8, %v1834_v55, %v2623_v13  ;;  %v4304_v13 = vld [vmem:[#allocation7_spill] sm:$0xff]  ;;  %v4305_v11 = vld [vmem:[#allocation8_spill] sm:$0xff] }
 0x245   : > { %v1829_v47 = vsel %vm364_vm9, %v1828_v24, %v2637_v17  ;;  %v1836_v36 = vsel %vm364_vm9, %v1835_v30, %v2638_v60  ;;  %v1621_v57 = vsel %vm360_vm7, %v1620_v42, %v2632_v7  ;;  %v1628_v54 = vsel %vm360_vm7, %v1627_v20, %v2633_v2 }
 0x246   : > { %v2063_v5 = vrot.slane %v1829_v47, 4 }
 0x249   : > { %v4162_v0 = vpop.permute.xlu0 %2625 }
 0x24a   : > { %v2023_v59 = vpop.permute.xlu1 %2022  ;;  %v2628_v6 = vunpack.i.h.bf16 %v4162_v0  ;;  %v2627_v16 = vunpack.i.l.bf16 %v4162_v0 }
 0x24b   : > { %v2041_v26 = vsel %vm362_vm8, %v2040_v56, %v2023_v59 }
 0x24c   : > { %v2042_v40 = vsel %vm364_vm9, %v2041_v26, %v2027_v62  ;;  %v2064_v26 = vrot.slane %v1836_v36, 4  ;;  %v1417_v27 = vsel %vm360_vm7, %v1416_v43, %v2628_v6 }
 0x24d   : > { %2219 = vmatpush.msk.msra.mxu1 %vm2067_vm10, %v2042_v40  ;;  %v1409_v40 = vsel %vm358_vm6, %v4144_v21, %v2612_v32  ;;  %v1418_v63 = vsel %vm362_vm8, %v1417_v27, %v2643_v31 }
 0x24e   : > { %v1410_v15 = vsel %vm360_vm7, %v1409_v40, %v2627_v16 }
 0x24f   : > { %v1411_v33 = vsel %vm362_vm8, %v1410_v15, %v2642_v29 }
 0x251   : > { %v1995_v3 = vpop.permute.xlu0 %1994 }
 0x252   : > { %v2034_v39 = vsel %vm362_vm8, %v2033_v53, %v1995_v3  ;;  %v1999_v10 = vpop.permute.xlu1 %1998 }
 0x253   : > { %v2035_v58 = vsel %vm364_vm9, %v2034_v39, %v1999_v10  ;;  %v169_v39 = vld [vmem:[%s4277_s1] sm:$0xff] }
 0x254   : > { %2217 = vmatpush.msk.msra.mxu0 %vm2067_vm10, %v2035_v58  ;;  %v4306_v10 = vld [vmem:[#allocation5_spill] sm:$0xff] }
 0x259   : > { %v2646_v38 = vpop.permute.xlu0 %2645 }
 0x25a   : > { %v2648_v61 = vunpack.i.h.bf16 %v2646_v38  ;;  %v2647_v35 = vunpack.i.l.bf16 %v2646_v38  ;;  %v2656_v49 = vpop.permute.xlu1 %2655 }
 0x25b   : > { %v2658_v51 = vunpack.i.h.bf16 %v2656_v49  ;;  %v2657_v56 = vunpack.i.l.bf16 %v2656_v49 }
 0x25c   : > { %v1622_v59 = vsel %vm362_vm8, %v1621_v57, %v2647_v35  ;;  %v1629_v62 = vsel %vm362_vm8, %v1628_v54, %v2648_v61 }
 0x25d   : > { %v1623_v28 = vsel %vm364_vm9, %v1622_v59, %v2657_v56  ;;  %v1630_v23 = vsel %vm364_vm9, %v1629_v62, %v2658_v51 }
 0x25e   : > { %v2074_v0 = vsel %vm2067_vm10, %v1623_v28, %v2063_v5  ;;  %v2075_v37 = vsel %vm2067_vm10, %v1630_v23, %v2064_v26 }
 0x25f   : > { %2103 = vmatpush.msra.mxu0 %v2074_v0  ;;  %2123 = vmatpush.msra.mxu1 %v2075_v37 }
 0x261   : > { %v2651_v4 = vpop.permute.xlu0 %2650 }
 0x262   : > { %v2653_v46 = vunpack.i.h.bf16 %v2651_v4  ;;  %v2652_v21 = vunpack.i.l.bf16 %v2651_v4 }
 0x264   : > { %v1412_v3 = vsel %vm364_vm9, %v1411_v33, %v2652_v21  ;;  %v1419_v18 = vsel %vm364_vm9, %v1418_v63, %v2653_v46 }
 0x265   : > { %v2057_v48 = vrot.slane %v1412_v3, 4  ;;  %v2058_v1 = vrot.slane %v1419_v18, 4 }
 0x267   : > { %v2072_v53 = vsel %vm2067_vm10, %v3679_v52, %v2057_v48  ;;  %v2073_v19 = vsel %vm2067_vm10, %v3686_v12, %v2058_v1 }
 0x268   : > { %2104 = vmatpush.msra.mxu0 %v2072_v53  ;;  %2124 = vmatpush.msra.mxu1 %v2073_v19 }
 0x26a   : > { %2105 = vmatpush.msra.mxu0 %v4304_v13  ;;  %2125 = vmatpush.msra.mxu1 %v4305_v11  ;;  %v2079_v52 = vpop.permute.xlu2 %2078 }
 0x26c   : > { %2106 = vmatpush.msra.mxu0 %v4306_v10  ;;  %2126 = vmatpush.msra.mxu1 %v4307_v9 }
 0x26d   : > { %2218 = vmatmul.msk.f32.vlgmr.msra.gmra.mxu0 %vm2081_vm11, %v169_v39  ;;  %2220 = vmatmul.msk.f32.vlgmr.msra.gmra.mxu1 %vm2081_vm11, %v169_v39 }
 0x2ea   : > { %v2108_v12 = vpop.f32.mrf.mxu0  ;;  %v2128_v44 = vpop.f32.mrf.mxu1 }
 0x2eb   : > { %v2109_v58 = vadd.f32 %v2108_v12, %v2079_v52  ;;  %v2129_v14 = vadd.f32 %v2128_v44, %v2079_v52 }
 0x2ed   : > { %2661 = vtanh.f32 %v2109_v58 }
 0x2ee   : > { %2663 = vtanh.f32 %v2129_v14 }
 0x2f3   : > { %v2662_v34 = vpop.eup %2661 }
 0x2f4   : > { %v2664_v8 = vpop.eup %2663  ;;  %2133 = vst [vmem:[%s163_s30] sm:$0xff] %v2662_v34 }
 0x2f5   : > { %2134 = vst [vmem:[%s163_s30 + $0x8] sm:$0xff] %v2664_v8 }
 0x2f6   : > { %2695 = shalt.err (!%p2692_p3)
}
 0x2f7   : > { %2228 = dma.vmem_to_hbm [thread:$0]  (%p2802_p5), %s2150_s4, 256, %s2152_s5, %s2136_s6  }
 0x2f8 PF: > { %p2234_p4 = scmp.ge.s32.totalorder %s2730_s15, 2  ;;  %s2163_s19 = sand.u32 1, %s2718_s12  }
 0x2f9   : > { %s2164_s20 = scalar_lea.sflag [#allocation3], %s2163_s19 }
 0x2fa   : > { %p2231_p7 = pnand %p2234_p4, %p2806_p6 }
 0x2fc   : > { %p2232_p8 = pneg %p2231_p7 }
 0x2fe   : > { %2713 = dma.done.wait (%p2232_p8), %s2164_s20, 256  }
 0x2ff   : > { %2715 = vsyncadd (%p2232_p8), %s2164_s20, 4294967040  ;;  %p13_p9 = scmp.ge.s32.totalorder %s2789_s18, 4   ;;  %s4308_s12 = smov %s2722_s13 }
 0x300   : > { %s4309_s13 = smov %s2726_s14  ;;  %s4310_s14 = smov %s2800_s21 }
 0x301   : > { %s4311_s15 = smov %s2789_s18  ;;  %15 = sbr.rel (!%p13_p9) target bundleno = 3 (0x3), region = 67 }
 0x306   :  { %2170 = vsyncpa [#allocation3], 1 }
 0x307   :  { %2172 = vsyncpa [#allocation3 + $0x1], 1 }

</bundles_post_ra>
